<compile_context>
chip_gen: v7x
topology: tpu7x:2x2x1
jax: 0.10.0
libtpu: 0.0.40
codegen_flags: <defaults>
</compile_context>

<pallas_src>
import functools

import jax
import jax.numpy as jnp
from jax.experimental import pallas as pl
from jax.experimental.pallas import tpu as pltpu


def _round_up(x: int, m: int) -> int:
    return ((x + m - 1) // m) * m


# ---------------------------------------------------------------------------
# Kernel
# ---------------------------------------------------------------------------
def _aura_gate_kernel(x_ref, outh_ref, rtr_ref, wr_ref, wd_ref, wu_ref, sel_ref,
                      final_ref, logits_ref, *, num_experts, topk):
    """One (TM, H) token tile: router -> softmax/top-k -> fused adapter experts."""
    E = num_experts
    E_pad = logits_ref.shape[-1]

    x = x_ref[...]                                   # (TM, H) moe_dtype
    r = rtr_ref[...]                                 # (TM, H) moe_dtype

    # ---- router: logits = r @ Wr -> (TM, E_pad); fp32 MXU accumulation ----
    logits_pad = jnp.dot(r, wr_ref[...], preferred_element_type=jnp.float32)
    logits_ref[...] = logits_pad.astype(logits_ref.dtype)      # lane-dense store

    # ---- lane-dense softmax over valid experts (padded columns -> -inf) ----
    lane_e = jax.lax.broadcasted_iota(jnp.int32, logits_pad.shape, 1)
    valid = lane_e < E
    # Round to moe_dtype first (matches the dtype the torch softmax would see).
    lg = logits_pad.astype(logits_ref.dtype).astype(jnp.float32)
    lg = jnp.where(valid, lg, -jnp.inf)
    mx = jnp.max(lg, axis=-1, keepdims=True)
    ex = jnp.exp(lg - mx)                            # padded cols -> exp(-inf) = 0
    rw = ex / jnp.sum(ex, axis=-1, keepdims=True)    # (TM, E_pad) fp32

    # ---- top-k selection (first-index tie-break, like torch.topk) ----
    remaining = jnp.where(valid, rw, -jnp.inf)       # padded cols never selected
    sel_mask = jnp.zeros_like(rw)
    for _ in range(topk):
        cur_max = jnp.max(remaining, axis=-1, keepdims=True)
        eq = remaining == cur_max
        idx = jnp.min(jnp.where(eq, lane_e, E_pad), axis=-1, keepdims=True)
        onehot = (lane_e == idx).astype(rw.dtype)
        sel_mask = sel_mask + onehot
        remaining = jnp.where(onehot > 0, -jnp.inf, remaining)

    # Renormalize over the selected top-k (softmax weights > 0, so sum > 0).
    p = rw * sel_mask
    p = p / jnp.sum(p, axis=-1, keepdims=True)       # (TM, E_pad)

    # Expand to one gate per fused adapter column (expert-major).  sel_ref is a
    # precomputed (E_pad, EA_pad) one-hot selector with `scaling` folded in, so
    # p_full[t, e*A + a] = scaling * p[t, e].
    p_full = jnp.dot(p, sel_ref[...], preferred_element_type=jnp.float32)   # (TM, EA_pad)

    # ---- fused experts: two MXU-sized matmuls ----
    h = jnp.dot(x, wd_ref[...], preferred_element_type=jnp.float32)         # (TM, EA_pad)
    h = jax.nn.gelu(h)   # TODO(synk): confirm tanh vs erf GELU in AuraParallelAdapterMLP
    gated = (h * p_full).astype(wu_ref.dtype)                               # (TM, EA_pad)
    y = jnp.dot(gated, wu_ref[...], preferred_element_type=jnp.float32)     # (TM, H)

    # sum_e p_e == 1 -> residual added exactly once (scaling already in p_full).
    # Residual read/upcast deferred here to keep its fp32 live range short.
    final_ref[...] = (y + outh_ref[...].astype(jnp.float32)).astype(final_ref.dtype)


# ---------------------------------------------------------------------------
# One-time weight preprocessing (do at parameter-load time, not per forward)
# ---------------------------------------------------------------------------
def prepare_aura_gate_params(params, *, scaling, moe_dtype=jnp.bfloat16):
    dt = jnp.dtype(moe_dtype)
    wr = jnp.asarray(params["router"]).astype(dt)      # (H, E)
    wd = jnp.asarray(params["down"]).astype(dt)        # (E, H, A)
    wu = jnp.asarray(params["up"]).astype(dt)          # (E, A, H)
    H, E = wr.shape
    A = wd.shape[2]
    EA = E * A
    E_pad = _round_up(max(E, 128), 128)      # lane-dense router logits
    EA_pad = _round_up(max(EA, 128), 128)    # lane/K-dense fused adapter dim

    if E_pad != E:
        wr = jnp.pad(wr, ((0, 0), (0, E_pad - E)))
    wd_all = jnp.transpose(wd, (1, 0, 2)).reshape(H, EA)    # (H, E*A)
    wu_all = wu.reshape(EA, H)                              # (E*A, H)
    if EA_pad != EA:
        wd_all = jnp.pad(wd_all, ((0, 0), (0, EA_pad - EA)))
        wu_all = jnp.pad(wu_all, ((0, EA_pad - EA), (0, 0)))

    # (E_pad, EA_pad) selector: selector[e, e*A + a] = scaling for valid (e, a).
    row_e = jnp.arange(E_pad)[:, None]
    col = jnp.arange(EA_pad)[None, :]
    sel = ((row_e == (col // A)) & (row_e < E) & (col < EA)).astype(jnp.float32)
    sel = sel * jnp.float32(scaling)

    return {
        "wr": wr, "wd_all": wd_all, "wu_all": wu_all, "selector": sel,
        "H": int(H), "E": int(E), "A": int(A),
        "E_pad": int(E_pad), "EA_pad": int(EA_pad),
        "scaling": float(scaling), "moe_dtype": dt,
    }


# ---------------------------------------------------------------------------
# VMEM budgeting (per-generation: 64 MiB physical on v7x, 128 MiB on v5e/v6e)
# ---------------------------------------------------------------------------
def _vmem_cap_bytes():
    phys = 128 * 2**20
    try:
        phys = int(getattr(pltpu.get_tpu_info(), "vmem_capacity_bytes", phys))
    except Exception:
        pass
    return max(32 * 2**20, int(phys * 0.80))   # leave headroom for compiler temps


def _estimate_vmem_bytes(tm, H, E_pad, EA_pad, itemsize):
    streamed_in = 2 * 3 * tm * H * itemsize                  # x, o, r (double-buffered)
    streamed_out = 2 * (tm * H + tm * E_pad) * itemsize      # final, logits (double-buffered)
    weights = (H * E_pad + 2 * H * EA_pad) * itemsize        # single-buffered (Buffered(1))
    selector = E_pad * EA_pad * 4
    temps = tm * (2 * H + 3 * EA_pad + 6 * E_pad) * 4        # fp32 intermediates (rough)
    return streamed_in + streamed_out + weights + selector + temps


# ---------------------------------------------------------------------------
# Wrapper
# ---------------------------------------------------------------------------
def aura_gate_adapter(input_hidden, output_hidden, router_hidden, params, *,
                      topk, scaling, moe_dtype=jnp.bfloat16, tm=256):
    """AuraGateAdapter forward. Returns (final_hidden_states, router_logits).

    `params` may be the raw dict (router/down/up) or the output of
    `prepare_aura_gate_params` (preferred: preprocess once at load time).
    """
    prepared = params if "wd_all" in params else prepare_aura_gate_params(
        params, scaling=scaling, moe_dtype=moe_dtype)
    dt = jnp.dtype(prepared["moe_dtype"])
    H, E = prepared["H"], prepared["E"]
    E_pad, EA_pad = prepared["E_pad"], prepared["EA_pad"]
    wr, wd_all, wu_all, sel = (prepared["wr"], prepared["wd_all"],
                               prepared["wu_all"], prepared["selector"])

    orig_shape = output_hidden.shape
    assert orig_shape[-1] == H
    x = input_hidden.reshape(-1, H).astype(dt)
    o = output_hidden.reshape(-1, H).astype(dt)
    r = router_hidden.reshape(-1, H).astype(dt)
    T = x.shape[0]

    # ---- token tiling ----
    # MXU-sized tiles (256 fills the 256-wide MXU M on v6e/v7x); cap for tiny T.
    tm_eff = max(8, min(tm, _round_up(T, 8)))
    # At least two grid steps so the "parallel" axis can shard across v7x's two
    # TensorCores (the extra step is ~0.35us overhead elsewhere).
    if T >= 16 and _round_up(T, tm_eff) // tm_eff < 2:
        tm_eff = max(8, _round_up(pl.cdiv(T, 2), 8))
    # Respect the per-generation VMEM budget: shrink the token tile rather than
    # letting the fp32 temps spill, but not below 128 (MXU M on v5e).
    cap = _vmem_cap_bytes()
    while (_estimate_vmem_bytes(tm_eff, H, E_pad, EA_pad, dt.itemsize) > cap
           and tm_eff > 128):
        tm_eff = max(128, _round_up(tm_eff // 2, 8))

    T_pad = _round_up(T, tm_eff)
    if T_pad != T:
        pad = ((0, T_pad - T), (0, 0))
        x = jnp.pad(x, pad)
        o = jnp.pad(o, pad)
        r = jnp.pad(r, pad)
    grid = (T_pad // tm_eff,)   # parallel token axis

    vmem_limit = int(min(cap, max(
        32 * 2**20,
        _estimate_vmem_bytes(tm_eff, H, E_pad, EA_pad, dt.itemsize) * 5 // 4)))

    kernel = functools.partial(_aura_gate_kernel, num_experts=E, topk=topk)

    def _call(single_buffer_weights):
        # Constant-index weight blocks are fetched once; single-buffer them.
        wmode = (dict(pipeline_mode=pl.Buffered(1))
                 if single_buffer_weights else {})
        return pl.pallas_call(
            kernel,
            out_shape=(jax.ShapeDtypeStruct((T_pad, H), dt),
                       jax.ShapeDtypeStruct((T_pad, E_pad), dt)),
            grid=grid,
            in_specs=[
                pl.BlockSpec((tm_eff, H), lambda i: (i, 0)),             # input hidden
                pl.BlockSpec((tm_eff, H), lambda i: (i, 0)),             # residual (aliased to out 0)
                pl.BlockSpec((tm_eff, H), lambda i: (i, 0)),             # router hidden
                pl.BlockSpec((H, E_pad), lambda i: (0, 0), **wmode),     # router weight
                pl.BlockSpec((H, EA_pad), lambda i: (0, 0), **wmode),    # fused down-proj
                pl.BlockSpec((EA_pad, H), lambda i: (0, 0), **wmode),    # fused up-proj
                pl.BlockSpec((E_pad, EA_pad), lambda i: (0, 0), **wmode),  # scaled selector
            ],
            out_specs=(
                pl.BlockSpec((tm_eff, H), lambda i: (i, 0)),             # final hidden states
                pl.BlockSpec((tm_eff, E_pad), lambda i: (i, 0)),         # router logits (lane-dense)
            ),
            # Residual stream and final output share tiling and the output tile
            # is fully overwritten -> safe to alias (saves one (T,H) HBM alloc).
            input_output_aliases={1: 0},
            compiler_params=pltpu.CompilerParams(
                dimension_semantics=("parallel",),
                vmem_limit_bytes=vmem_limit,
            ),
        )(x, o, r, wr, wd_all, wu_all, sel)

    try:
        final, logits = _call(True)
    except Exception:
        # Fallback if this JAX build rejects Buffered(1) on constant-index blocks.
        final, logits = _call(False)

    return final[:T].reshape(orig_shape), logits[:T, :E]


# ---------------------------------------------------------------------------
# Pure-JAX reference mirroring the torch module (eval mode)
# ---------------------------------------------------------------------------
def aura_gate_adapter_reference(input_hidden, output_hidden, router_hidden,
                                params, *, topk, scaling, moe_dtype,
                                router_logits=None):
    orig_shape = output_hidden.shape
    H = orig_shape[-1]
    dt = jnp.dtype(moe_dtype)
    hi = jax.lax.Precision.HIGHEST

    x = input_hidden.reshape(-1, H).astype(dt)
    o = output_hidden.reshape(-1, H).astype(dt).astype(jnp.float32)
    r = router_hidden.reshape(-1, H).astype(dt)
    wr = params["router"].astype(dt)
    wd = params["down"].astype(dt)
    wu = params["up"].astype(dt)
    E = wr.shape[1]
    T = x.shape[0]

    if router_logits is None:
        router_logits = jnp.dot(r, wr, preferred_element_type=jnp.float32,
                                precision=hi).astype(dt)
    rw = jax.nn.softmax(router_logits.astype(jnp.float32), axis=-1)
    top_w, top_i = jax.lax.top_k(rw, topk)
    top_w = top_w / jnp.sum(top_w, axis=-1, keepdims=True)
    p = jnp.zeros((T, E), jnp.float32)
    p = p.at[jnp.arange(T)[:, None], top_i].add(top_w)

    acc = jnp.zeros_like(o)
    for e in range(E):
        h = jnp.dot(x, wd[e], preferred_element_type=jnp.float32, precision=hi)
        g = jax.nn.gelu(h).astype(dt)
        y = scaling * jnp.dot(g, wu[e], preferred_element_type=jnp.float32,
                              precision=hi)
        acc = acc + p[:, e:e + 1] * (y + o)
    return acc.astype(dt).reshape(orig_shape), router_logits


if __name__ == "__main__":
    batch, seq = 2, 8
    hidden_size = 128
    adapter_dim = 32
    num_experts = 8
    topk = 2
    moe_scaling = 2.0

    key = jax.random.PRNGKey(0)
    k_in, k_out, k_rtr, k_wr, k_wd, k_wu = jax.random.split(key, 6)

    input_hidden = jax.random.normal(k_in, (batch, seq, hidden_size), jnp.float32)
    output_hidden = jax.random.normal(k_out, (batch, seq, hidden_size), jnp.float32)
    router_hidden = jax.random.normal(k_rtr, (batch, seq, hidden_size), jnp.float32)

    params = {
        "router": jax.random.normal(k_wr, (hidden_size, num_experts), jnp.float32) * 0.05,
        "down":   jax.random.normal(k_wd, (num_experts, hidden_size, adapter_dim), jnp.float32) * 0.05,
        "up":     jax.random.normal(k_wu, (num_experts, adapter_dim, hidden_size), jnp.float32) * 0.05,
    }

    # --- fp32 path (moe_dtype="float32") + parity check vs pure-JAX reference ---
    prepared_f32 = prepare_aura_gate_params(params, scaling=moe_scaling,
                                            moe_dtype=jnp.float32)
    final32, logits32 = aura_gate_adapter(
        input_hidden, output_hidden, router_hidden, prepared_f32,
        topk=topk, scaling=moe_scaling, moe_dtype=jnp.float32)
    jax.block_until_ready((final32, logits32))
    assert final32.shape == (batch, seq, hidden_size)
    assert logits32.shape == (batch * seq, num_experts)

    ref_logits = jnp.dot(router_hidden.reshape(-1, hidden_size), params["router"],
                         precision=jax.lax.Precision.HIGHEST)
    assert bool(jnp.allclose(logits32, ref_logits, rtol=2e-2, atol=2e-2))

    # Use the kernel's logits for the reference routing so the comparison checks
    # the expert math without sensitivity to top-k near-ties.
    ref_final, _ = aura_gate_adapter_reference(
        input_hidden, output_hidden, router_hidden, params,
        topk=topk, scaling=moe_scaling, moe_dtype=jnp.float32,
        router_logits=logits32)
    assert bool(jnp.allclose(final32, ref_final, rtol=3e-2, atol=3e-2))

    # --- bf16 path (production dtype: bf16 streams/weights, fp32 accumulation) ---
    prepared_bf16 = prepare_aura_gate_params(params, scaling=moe_scaling,
                                             moe_dtype=jnp.bfloat16)
    final_bf16, logits_bf16 = aura_gate_adapter(
        input_hidden, output_hidden, router_hidden, prepared_bf16,
        topk=topk, scaling=moe_scaling, moe_dtype=jnp.bfloat16)
    jax.block_until_ready((final_bf16, logits_bf16))
    assert final_bf16.shape == (batch, seq, hidden_size)
    assert final_bf16.dtype == jnp.bfloat16
    assert bool(jnp.all(jnp.isfinite(final_bf16.astype(jnp.float32))))
    assert bool(jnp.all(jnp.isfinite(logits_bf16.astype(jnp.float32))))

    print("KERNEL_OK")
</pallas_src>

<mosaic_0001>
module attributes {stable_mosaic.version = 11 : i64} {
  func.func @_aura_gate_kernel(%arg0: i32, %arg1: memref<8x128xf32, #tpu.memory_space<vmem>>, %arg2: memref<8x128xf32, #tpu.memory_space<vmem>>, %arg3: memref<8x128xf32, #tpu.memory_space<vmem>>, %arg4: memref<128x128xf32, #tpu.memory_space<vmem>>, %arg5: memref<128x256xf32, #tpu.memory_space<vmem>>, %arg6: memref<256x128xf32, #tpu.memory_space<vmem>>, %arg7: memref<128x256xf32, #tpu.memory_space<vmem>>, %arg8: memref<8x128xf32, #tpu.memory_space<vmem>>, %arg9: memref<8x128xf32, #tpu.memory_space<vmem>>) attributes {dimension_semantics = [#tpu.dimension_semantics<parallel>], iteration_bounds = array<i64: 2>, scalar_prefetch = 0 : i64, scratch_operands = 0 : i64, tpu.core_type = #tpu.core_type<tc>, window_params = [{transform_indices = @transform_0, window_bounds = array<i64: 8, 128>}, {transform_indices = @transform_1, window_bounds = array<i64: 8, 128>}, {transform_indices = @transform_2, window_bounds = array<i64: 8, 128>}, {pipeline_mode = #tpu.pipeline_mode<synchronous>, transform_indices = @transform_3, window_bounds = array<i64: 128, 128>}, {pipeline_mode = #tpu.pipeline_mode<synchronous>, transform_indices = @transform_4, window_bounds = array<i64: 128, 256>}, {pipeline_mode = #tpu.pipeline_mode<synchronous>, transform_indices = @transform_5, window_bounds = array<i64: 256, 128>}, {pipeline_mode = #tpu.pipeline_mode<synchronous>, transform_indices = @transform_6, window_bounds = array<i64: 128, 256>}, {transform_indices = @transform_7, window_bounds = array<i64: 8, 128>}, {transform_indices = @transform_8, window_bounds = array<i64: 8, 128>}]} {
    %c0 = arith.constant 0 : index
    %c0_0 = arith.constant 0 : index
    %0 = vector.load %arg1[%c0, %c0_0] : memref<8x128xf32, #tpu.memory_space<vmem>>, vector<8x128xf32>
    %c0_1 = arith.constant 0 : index
    %c0_2 = arith.constant 0 : index
    %1 = vector.load %arg3[%c0_1, %c0_2] : memref<8x128xf32, #tpu.memory_space<vmem>>, vector<8x128xf32>
    %c0_3 = arith.constant 0 : index
    %c0_4 = arith.constant 0 : index
    %2 = vector.load %arg4[%c0_3, %c0_4] : memref<128x128xf32, #tpu.memory_space<vmem>>, vector<128x128xf32>
    %cst = arith.constant dense<0.000000e+00> : vector<8x128xf32>
    %3 = tpu.matmul %1, %2, %cst {dimension_numbers = #tpu.dot_dimension_numbers<[1], [0], [0], [1], [0, 0, 1, 1], [], []>} : vector<8x128xf32>, vector<128x128xf32>, vector<8x128xf32> -> vector<8x128xf32>
    %c0_5 = arith.constant 0 : index
    %c0_6 = arith.constant 0 : index
    %4 = vector.load %arg9[%c0_5, %c0_6] : memref<8x128xf32, #tpu.memory_space<vmem>>, vector<8x128xf32>
    tpu.vector_store %arg9[%c0_5, %c0_6], %3 {strides = array<i32>} : memref<8x128xf32, #tpu.memory_space<vmem>>, vector<8x128xf32>,
    %5 = tpu.iota {dimensions = array<i32: 1>} : vector<8x128xi32>
    %c8_i32 = arith.constant 8 : i32
    %6 = vector.broadcast %c8_i32 : i32 to vector<8x128xi32>
    %7 = arith.cmpi slt, %5, %6 : vector<8x128xi32>
    %cst_7 = arith.constant 0xFF800000 : f32
    %8 = vector.broadcast %cst_7 : f32 to vector<8x128xf32>
    %9 = arith.select %7, %3, %8 : vector<8x128xi1>, vector<8x128xf32>
    %cst_8 = arith.constant dense<0xFF800000> : vector<8xf32>
    %10 = vector.multi_reduction <maximumf>, %9, %cst_8 [1] : vector<8x128xf32> to vector<8xf32>
    %11 = vector.shape_cast %10 : vector<8xf32> to vector<8x1xf32>
    %12 = vector.broadcast %11 : vector<8x1xf32> to vector<8x128xf32>
    %13 = arith.subf %9, %12 : vector<8x128xf32>
    %14 = math.exp %13 : vector<8x128xf32>
    %cst_9 = arith.constant dense<0.000000e+00> : vector<8xf32>
    %15 = vector.multi_reduction <add>, %14, %cst_9 [1] : vector<8x128xf32> to vector<8xf32>
    %16 = vector.shape_cast %15 : vector<8xf32> to vector<8x1xf32>
    %17 = vector.broadcast %16 : vector<8x1xf32> to vector<8x128xf32>
    %18 = arith.divf %14, %17 : vector<8x128xf32>
    %cst_10 = arith.constant 0xFF800000 : f32
    %19 = vector.broadcast %cst_10 : f32 to vector<8x128xf32>
    %20 = arith.select %7, %18, %19 : vector<8x128xi1>, vector<8x128xf32>
    %cst_11 = arith.constant 0.000000e+00 : f32
    %21 = vector.broadcast %cst_11 : f32 to vector<8x128xf32>
    %cst_12 = arith.constant dense<0xFF800000> : vector<8xf32>
    %22 = vector.multi_reduction <maximumf>, %20, %cst_12 [1] : vector<8x128xf32> to vector<8xf32>
    %23 = vector.shape_cast %22 : vector<8xf32> to vector<8x1xf32>
    %24 = vector.broadcast %23 : vector<8x1xf32> to vector<8x128xf32>
    %25 = arith.cmpf oeq, %20, %24 : vector<8x128xf32>
    %c128_i32 = arith.constant 128 : i32
    %26 = vector.broadcast %c128_i32 : i32 to vector<8x128xi32>
    %27 = arith.select %25, %5, %26 : vector<8x128xi1>, vector<8x128xi32>
    %cst_13 = arith.constant dense<2147483647> : vector<8xi32>
    %28 = vector.multi_reduction <minsi>, %27, %cst_13 [1] : vector<8x128xi32> to vector<8xi32>
    %29 = vector.shape_cast %28 : vector<8xi32> to vector<8x1xi32>
    %30 = vector.broadcast %29 : vector<8x1xi32> to vector<8x128xi32>
    %31 = arith.cmpi eq, %5, %30 : vector<8x128xi32>
    %32 = arith.extui %31 : vector<8x128xi1> to vector<8x128xi32>
    %33 = arith.sitofp %32 : vector<8x128xi32> to vector<8x128xf32>
    %34 = arith.addf %21, %33 : vector<8x128xf32>
    %cst_14 = arith.constant 0.000000e+00 : f32
    %35 = vector.broadcast %cst_14 : f32 to vector<8x128xf32>
    %36 = arith.cmpf ogt, %33, %35 : vector<8x128xf32>
    %cst_15 = arith.constant 0xFF800000 : f32
    %37 = vector.broadcast %cst_15 : f32 to vector<8x128xf32>
    %38 = arith.select %36, %37, %20 : vector<8x128xi1>, vector<8x128xf32>
    %cst_16 = arith.constant dense<0xFF800000> : vector<8xf32>
    %39 = vector.multi_reduction <maximumf>, %38, %cst_16 [1] : vector<8x128xf32> to vector<8xf32>
    %40 = vector.shape_cast %39 : vector<8xf32> to vector<8x1xf32>
    %41 = vector.broadcast %40 : vector<8x1xf32> to vector<8x128xf32>
    %42 = arith.cmpf oeq, %38, %41 : vector<8x128xf32>
    %c128_i32_17 = arith.constant 128 : i32
    %43 = vector.broadcast %c128_i32_17 : i32 to vector<8x128xi32>
    %44 = arith.select %42, %5, %43 : vector<8x128xi1>, vector<8x128xi32>
    %cst_18 = arith.constant dense<2147483647> : vector<8xi32>
    %45 = vector.multi_reduction <minsi>, %44, %cst_18 [1] : vector<8x128xi32> to vector<8xi32>
    %46 = vector.shape_cast %45 : vector<8xi32> to vector<8x1xi32>
    %47 = vector.broadcast %46 : vector<8x1xi32> to vector<8x128xi32>
    %48 = arith.cmpi eq, %5, %47 : vector<8x128xi32>
    %49 = arith.extui %48 : vector<8x128xi1> to vector<8x128xi32>
    %50 = arith.sitofp %49 : vector<8x128xi32> to vector<8x128xf32>
    %51 = arith.addf %34, %50 : vector<8x128xf32>
    %52 = arith.mulf %18, %51 : vector<8x128xf32>
    %cst_19 = arith.constant dense<0.000000e+00> : vector<8xf32>
    %53 = vector.multi_reduction <add>, %52, %cst_19 [1] : vector<8x128xf32> to vector<8xf32>
    %54 = vector.shape_cast %53 : vector<8xf32> to vector<8x1xf32>
    %55 = vector.broadcast %54 : vector<8x1xf32> to vector<8x128xf32>
    %56 = arith.divf %52, %55 : vector<8x128xf32>
    %c0_20 = arith.constant 0 : index
    %c0_21 = arith.constant 0 : index
    %57 = vector.load %arg7[%c0_20, %c0_21] : memref<128x256xf32, #tpu.memory_space<vmem>>, vector<128x256xf32>
    %cst_22 = arith.constant dense<0.000000e+00> : vector<8x256xf32>
    %58 = tpu.matmul %56, %57, %cst_22 {dimension_numbers = #tpu.dot_dimension_numbers<[1], [0], [0], [1], [0, 0, 1, 1], [], []>} : vector<8x128xf32>, vector<128x256xf32>, vector<8x256xf32> -> vector<8x256xf32>
    %c0_23 = arith.constant 0 : index
    %c0_24 = arith.constant 0 : index
    %59 = vector.load %arg5[%c0_23, %c0_24] : memref<128x256xf32, #tpu.memory_space<vmem>>, vector<128x256xf32>
    %cst_25 = arith.constant dense<0.000000e+00> : vector<8x256xf32>
    %60 = tpu.matmul %0, %59, %cst_25 {dimension_numbers = #tpu.dot_dimension_numbers<[1], [0], [0], [1], [0, 0, 1, 1], [], []>} : vector<8x128xf32>, vector<128x256xf32>, vector<8x256xf32> -> vector<8x256xf32>
    %61 = arith.mulf %60, %60 : vector<8x256xf32>
    %62 = arith.mulf %60, %61 : vector<8x256xf32>
    %cst_26 = arith.constant 4.471500e-02 : f32
    %63 = vector.broadcast %cst_26 : f32 to vector<8x256xf32>
    %64 = arith.mulf %63, %62 : vector<8x256xf32>
    %65 = arith.addf %60, %64 : vector<8x256xf32>
    %cst_27 = arith.constant 0.797884583 : f32
    %66 = vector.broadcast %cst_27 : f32 to vector<8x256xf32>
    %67 = arith.mulf %66, %65 : vector<8x256xf32>
    %68 = math.tanh %67 : vector<8x256xf32>
    %cst_28 = arith.constant 1.000000e+00 : f32
    %69 = vector.broadcast %cst_28 : f32 to vector<8x256xf32>
    %70 = arith.addf %69, %68 : vector<8x256xf32>
    %cst_29 = arith.constant 5.000000e-01 : f32
    %71 = vector.broadcast %cst_29 : f32 to vector<8x256xf32>
    %72 = arith.mulf %71, %70 : vector<8x256xf32>
    %73 = arith.mulf %60, %72 : vector<8x256xf32>
    %74 = arith.mulf %73, %58 : vector<8x256xf32>
    %c0_30 = arith.constant 0 : index
    %c0_31 = arith.constant 0 : index
    %75 = vector.load %arg6[%c0_30, %c0_31] : memref<256x128xf32, #tpu.memory_space<vmem>>, vector<256x128xf32>
    %cst_32 = arith.constant dense<0.000000e+00> : vector<8x128xf32>
    %76 = tpu.matmul %74, %75, %cst_32 {dimension_numbers = #tpu.dot_dimension_numbers<[1], [0], [0], [1], [0, 0, 1, 1], [], []>} : vector<8x256xf32>, vector<256x128xf32>, vector<8x128xf32> -> vector<8x128xf32>
    %c0_33 = arith.constant 0 : index
    %c0_34 = arith.constant 0 : index
    %77 = vector.load %arg2[%c0_33, %c0_34] : memref<8x128xf32, #tpu.memory_space<vmem>>, vector<8x128xf32>
    %78 = arith.addf %76, %77 : vector<8x128xf32>
    %c0_35 = arith.constant 0 : index
    %c0_36 = arith.constant 0 : index
    %79 = vector.load %arg8[%c0_35, %c0_36] : memref<8x128xf32, #tpu.memory_space<vmem>>, vector<8x128xf32>
    tpu.vector_store %arg8[%c0_35, %c0_36], %78 {strides = array<i32>} : memref<8x128xf32, #tpu.memory_space<vmem>>, vector<8x128xf32>,
    return
  }
  func.func @transform_0(%arg0: i32) -> (i32, i32) {
    %c0_i32 = arith.constant 0 : i32
    %c0_i32_0 = arith.constant 0 : i32
    return %arg0, %c0_i32 : i32, i32
  }
  func.func @transform_1(%arg0: i32) -> (i32, i32) {
    %c0_i32 = arith.constant 0 : i32
    %c0_i32_0 = arith.constant 0 : i32
    return %arg0, %c0_i32 : i32, i32
  }
  func.func @transform_2(%arg0: i32) -> (i32, i32) {
    %c0_i32 = arith.constant 0 : i32
    %c0_i32_0 = arith.constant 0 : i32
    return %arg0, %c0_i32 : i32, i32
  }
  func.func @transform_3(%arg0: i32) -> (i32, i32) {
    %c0_i32 = arith.constant 0 : i32
    %c0_i32_0 = arith.constant 0 : i32
    %c0_i32_1 = arith.constant 0 : i32
    return %c0_i32, %c0_i32_0 : i32, i32
  }
  func.func @transform_4(%arg0: i32) -> (i32, i32) {
    %c0_i32 = arith.constant 0 : i32
    %c0_i32_0 = arith.constant 0 : i32
    %c0_i32_1 = arith.constant 0 : i32
    return %c0_i32, %c0_i32_0 : i32, i32
  }
  func.func @transform_5(%arg0: i32) -> (i32, i32) {
    %c0_i32 = arith.constant 0 : i32
    %c0_i32_0 = arith.constant 0 : i32
    %c0_i32_1 = arith.constant 0 : i32
    return %c0_i32, %c0_i32_0 : i32, i32
  }
  func.func @transform_6(%arg0: i32) -> (i32, i32) {
    %c0_i32 = arith.constant 0 : i32
    %c0_i32_0 = arith.constant 0 : i32
    %c0_i32_1 = arith.constant 0 : i32
    return %c0_i32, %c0_i32_0 : i32, i32
  }
  func.func @transform_7(%arg0: i32) -> (i32, i32) {
    %c0_i32 = arith.constant 0 : i32
    %c0_i32_0 = arith.constant 0 : i32
    return %arg0, %c0_i32 : i32, i32
  }
  func.func @transform_8(%arg0: i32) -> (i32, i32) {
    %c0_i32 = arith.constant 0 : i32
    %c0_i32_0 = arith.constant 0 : i32
    return %arg0, %c0_i32 : i32, i32
  }
}

module attributes {stable_mosaic.version = 11 : i64} {
  func.func @_aura_gate_kernel(%arg0: i32, %arg1: memref<8x128xf32, #tpu.memory_space<vmem>>, %arg2: memref<8x128xf32, #tpu.memory_space<vmem>>, %arg3: memref<8x128xf32, #tpu.memory_space<vmem>>, %arg4: memref<128x128xf32, #tpu.memory_space<vmem>>, %arg5: memref<128x256xf32, #tpu.memory_space<vmem>>, %arg6: memref<256x128xf32, #tpu.memory_space<vmem>>, %arg7: memref<128x256xf32, #tpu.memory_space<vmem>>, %arg8: memref<8x128xf32, #tpu.memory_space<vmem>>, %arg9: memref<8x128xf32, #tpu.memory_space<vmem>>) attributes {dimension_semantics = [#tpu.dimension_semantics<parallel>], iteration_bounds = array<i64: 2>, scalar_prefetch = 0 : i64, scratch_operands = 0 : i64, tpu.core_type = #tpu.core_type<tc>, window_params = [{transform_indices = @transform_0, window_bounds = array<i64: 8, 128>}, {transform_indices = @transform_1, window_bounds = array<i64: 8, 128>}, {transform_indices = @transform_2, window_bounds = array<i64: 8, 128>}, {pipeline_mode = #tpu.pipeline_mode<synchronous>, transform_indices = @transform_3, window_bounds = array<i64: 128, 128>}, {pipeline_mode = #tpu.pipeline_mode<synchronous>, transform_indices = @transform_4, window_bounds = array<i64: 128, 256>}, {pipeline_mode = #tpu.pipeline_mode<synchronous>, transform_indices = @transform_5, window_bounds = array<i64: 256, 128>}, {pipeline_mode = #tpu.pipeline_mode<synchronous>, transform_indices = @transform_6, window_bounds = array<i64: 128, 256>}, {transform_indices = @transform_7, window_bounds = array<i64: 8, 128>}, {transform_indices = @transform_8, window_bounds = array<i64: 8, 128>}]} {
    %c0 = arith.constant 0 : index
    %c0_0 = arith.constant 0 : index
    %0 = vector.load %arg1[%c0, %c0_0] : memref<8x128xf32, #tpu.memory_space<vmem>>, vector<8x128xf32>
    %c0_1 = arith.constant 0 : index
    %c0_2 = arith.constant 0 : index
    %1 = vector.load %arg3[%c0_1, %c0_2] : memref<8x128xf32, #tpu.memory_space<vmem>>, vector<8x128xf32>
    %c0_3 = arith.constant 0 : index
    %c0_4 = arith.constant 0 : index
    %2 = vector.load %arg4[%c0_3, %c0_4] : memref<128x128xf32, #tpu.memory_space<vmem>>, vector<128x128xf32>
    %cst = arith.constant dense<0.000000e+00> : vector<8x128xf32>
    %3 = tpu.matmul %1, %2, %cst {dimension_numbers = #tpu.dot_dimension_numbers<[1], [0], [0], [1], [0, 0, 1, 1], [], []>} : vector<8x128xf32>, vector<128x128xf32>, vector<8x128xf32> -> vector<8x128xf32>
    %c0_5 = arith.constant 0 : index
    %c0_6 = arith.constant 0 : index
    %4 = vector.load %arg9[%c0_5, %c0_6] : memref<8x128xf32, #tpu.memory_space<vmem>>, vector<8x128xf32>
    tpu.vector_store %arg9[%c0_5, %c0_6], %3 {strides = array<i32>} : memref<8x128xf32, #tpu.memory_space<vmem>>, vector<8x128xf32>,
    %5 = tpu.iota {dimensions = array<i32: 1>} : vector<8x128xi32>
    %c8_i32 = arith.constant 8 : i32
    %6 = vector.broadcast %c8_i32 : i32 to vector<8x128xi32>
    %7 = arith.cmpi slt, %5, %6 : vector<8x128xi32>
    %cst_7 = arith.constant 0xFF800000 : f32
    %8 = vector.broadcast %cst_7 : f32 to vector<8x128xf32>
    %9 = arith.select %7, %3, %8 : vector<8x128xi1>, vector<8x128xf32>
    %cst_8 = arith.constant dense<0xFF800000> : vector<8xf32>
    %10 = vector.multi_reduction <maximumf>, %9, %cst_8 [1] : vector<8x128xf32> to vector<8xf32>
    %11 = vector.shape_cast %10 : vector<8xf32> to vector<8x1xf32>
    %12 = vector.broadcast %11 : vector<8x1xf32> to vector<8x128xf32>
    %13 = arith.subf %9, %12 : vector<8x128xf32>
    %14 = math.exp %13 : vector<8x128xf32>
    %cst_9 = arith.constant dense<0.000000e+00> : vector<8xf32>
    %15 = vector.multi_reduction <add>, %14, %cst_9 [1] : vector<8x128xf32> to vector<8xf32>
    %16 = vector.shape_cast %15 : vector<8xf32> to vector<8x1xf32>
    %17 = vector.broadcast %16 : vector<8x1xf32> to vector<8x128xf32>
    %18 = arith.divf %14, %17 : vector<8x128xf32>
    %cst_10 = arith.constant 0xFF800000 : f32
    %19 = vector.broadcast %cst_10 : f32 to vector<8x128xf32>
    %20 = arith.select %7, %18, %19 : vector<8x128xi1>, vector<8x128xf32>
    %cst_11 = arith.constant 0.000000e+00 : f32
    %21 = vector.broadcast %cst_11 : f32 to vector<8x128xf32>
    %cst_12 = arith.constant dense<0xFF800000> : vector<8xf32>
    %22 = vector.multi_reduction <maximumf>, %20, %cst_12 [1] : vector<8x128xf32> to vector<8xf32>
    %23 = vector.shape_cast %22 : vector<8xf32> to vector<8x1xf32>
    %24 = vector.broadcast %23 : vector<8x1xf32> to vector<8x128xf32>
    %25 = arith.cmpf oeq, %20, %24 : vector<8x128xf32>
    %c128_i32 = arith.constant 128 : i32
    %26 = vector.broadcast %c128_i32 : i32 to vector<8x128xi32>
    %27 = arith.select %25, %5, %26 : vector<8x128xi1>, vector<8x128xi32>
    %cst_13 = arith.constant dense<2147483647> : vector<8xi32>
    %28 = vector.multi_reduction <minsi>, %27, %cst_13 [1] : vector<8x128xi32> to vector<8xi32>
    %29 = vector.shape_cast %28 : vector<8xi32> to vector<8x1xi32>
    %30 = vector.broadcast %29 : vector<8x1xi32> to vector<8x128xi32>
    %31 = arith.cmpi eq, %5, %30 : vector<8x128xi32>
    %32 = arith.extui %31 : vector<8x128xi1> to vector<8x128xi32>
    %33 = arith.sitofp %32 : vector<8x128xi32> to vector<8x128xf32>
    %34 = arith.addf %21, %33 : vector<8x128xf32>
    %cst_14 = arith.constant 0.000000e+00 : f32
    %35 = vector.broadcast %cst_14 : f32 to vector<8x128xf32>
    %36 = arith.cmpf ogt, %33, %35 : vector<8x128xf32>
    %cst_15 = arith.constant 0xFF800000 : f32
    %37 = vector.broadcast %cst_15 : f32 to vector<8x128xf32>
    %38 = arith.select %36, %37, %20 : vector<8x128xi1>, vector<8x128xf32>
    %cst_16 = arith.constant dense<0xFF800000> : vector<8xf32>
    %39 = vector.multi_reduction <maximumf>, %38, %cst_16 [1] : vector<8x128xf32> to vector<8xf32>
    %40 = vector.shape_cast %39 : vector<8xf32> to vector<8x1xf32>
    %41 = vector.broadcast %40 : vector<8x1xf32> to vector<8x128xf32>
    %42 = arith.cmpf oeq, %38, %41 : vector<8x128xf32>
    %c128_i32_17 = arith.constant 128 : i32
    %43 = vector.broadcast %c128_i32_17 : i32 to vector<8x128xi32>
    %44 = arith.select %42, %5, %43 : vector<8x128xi1>, vector<8x128xi32>
    %cst_18 = arith.constant dense<2147483647> : vector<8xi32>
    %45 = vector.multi_reduction <minsi>, %44, %cst_18 [1] : vector<8x128xi32> to vector<8xi32>
    %46 = vector.shape_cast %45 : vector<8xi32> to vector<8x1xi32>
    %47 = vector.broadcast %46 : vector<8x1xi32> to vector<8x128xi32>
    %48 = arith.cmpi eq, %5, %47 : vector<8x128xi32>
    %49 = arith.extui %48 : vector<8x128xi1> to vector<8x128xi32>
    %50 = arith.sitofp %49 : vector<8x128xi32> to vector<8x128xf32>
    %51 = arith.addf %34, %50 : vector<8x128xf32>
    %52 = arith.mulf %18, %51 : vector<8x128xf32>
    %cst_19 = arith.constant dense<0.000000e+00> : vector<8xf32>
    %53 = vector.multi_reduction <add>, %52, %cst_19 [1] : vector<8x128xf32> to vector<8xf32>
    %54 = vector.shape_cast %53 : vector<8xf32> to vector<8x1xf32>
    %55 = vector.broadcast %54 : vector<8x1xf32> to vector<8x128xf32>
    %56 = arith.divf %52, %55 : vector<8x128xf32>
    %c0_20 = arith.constant 0 : index
    %c0_21 = arith.constant 0 : index
    %57 = vector.load %arg7[%c0_20, %c0_21] : memref<128x256xf32, #tpu.memory_space<vmem>>, vector<128x256xf32>
    %cst_22 = arith.constant dense<0.000000e+00> : vector<8x256xf32>
    %58 = tpu.matmul %56, %57, %cst_22 {dimension_numbers = #tpu.dot_dimension_numbers<[1], [0], [0], [1], [0, 0, 1, 1], [], []>} : vector<8x128xf32>, vector<128x256xf32>, vector<8x256xf32> -> vector<8x256xf32>
    %c0_23 = arith.constant 0 : index
    %c0_24 = arith.constant 0 : index
    %59 = vector.load %arg5[%c0_23, %c0_24] : memref<128x256xf32, #tpu.memory_space<vmem>>, vector<128x256xf32>
    %cst_25 = arith.constant dense<0.000000e+00> : vector<8x256xf32>
    %60 = tpu.matmul %0, %59, %cst_25 {dimension_numbers = #tpu.dot_dimension_numbers<[1], [0], [0], [1], [0, 0, 1, 1], [], []>} : vector<8x128xf32>, vector<128x256xf32>, vector<8x256xf32> -> vector<8x256xf32>
    %61 = arith.mulf %60, %60 : vector<8x256xf32>
    %62 = arith.mulf %60, %61 : vector<8x256xf32>
    %cst_26 = arith.constant 4.471500e-02 : f32
    %63 = vector.broadcast %cst_26 : f32 to vector<8x256xf32>
    %64 = arith.mulf %63, %62 : vector<8x256xf32>
    %65 = arith.addf %60, %64 : vector<8x256xf32>
    %cst_27 = arith.constant 0.797884583 : f32
    %66 = vector.broadcast %cst_27 : f32 to vector<8x256xf32>
    %67 = arith.mulf %66, %65 : vector<8x256xf32>
    %68 = math.tanh %67 : vector<8x256xf32>
    %cst_28 = arith.constant 1.000000e+00 : f32
    %69 = vector.broadcast %cst_28 : f32 to vector<8x256xf32>
    %70 = arith.addf %69, %68 : vector<8x256xf32>
    %cst_29 = arith.constant 5.000000e-01 : f32
    %71 = vector.broadcast %cst_29 : f32 to vector<8x256xf32>
    %72 = arith.mulf %71, %70 : vector<8x256xf32>
    %73 = arith.mulf %60, %72 : vector<8x256xf32>
    %74 = arith.mulf %73, %58 : vector<8x256xf32>
    %c0_30 = arith.constant 0 : index
    %c0_31 = arith.constant 0 : index
    %75 = vector.load %arg6[%c0_30, %c0_31] : memref<256x128xf32, #tpu.memory_space<vmem>>, vector<256x128xf32>
    %cst_32 = arith.constant dense<0.000000e+00> : vector<8x128xf32>
    %76 = tpu.matmul %74, %75, %cst_32 {dimension_numbers = #tpu.dot_dimension_numbers<[1], [0], [0], [1], [0, 0, 1, 1], [], []>} : vector<8x256xf32>, vector<256x128xf32>, vector<8x128xf32> -> vector<8x128xf32>
    %c0_33 = arith.constant 0 : index
    %c0_34 = arith.constant 0 : index
    %77 = vector.load %arg2[%c0_33, %c0_34] : memref<8x128xf32, #tpu.memory_space<vmem>>, vector<8x128xf32>
    %78 = arith.addf %76, %77 : vector<8x128xf32>
    %c0_35 = arith.constant 0 : index
    %c0_36 = arith.constant 0 : index
    %79 = vector.load %arg8[%c0_35, %c0_36] : memref<8x128xf32, #tpu.memory_space<vmem>>, vector<8x128xf32>
    tpu.vector_store %arg8[%c0_35, %c0_36], %78 {strides = array<i32>} : memref<8x128xf32, #tpu.memory_space<vmem>>, vector<8x128xf32>,
    return
  }
  func.func @transform_0(%arg0: i32) -> (i32, i32) {
    %c0_i32 = arith.constant 0 : i32
    %c0_i32_0 = arith.constant 0 : i32
    return %arg0, %c0_i32 : i32, i32
  }
  func.func @transform_1(%arg0: i32) -> (i32, i32) {
    %c0_i32 = arith.constant 0 : i32
    %c0_i32_0 = arith.constant 0 : i32
    return %arg0, %c0_i32 : i32, i32
  }
  func.func @transform_2(%arg0: i32) -> (i32, i32) {
    %c0_i32 = arith.constant 0 : i32
    %c0_i32_0 = arith.constant 0 : i32
    return %arg0, %c0_i32 : i32, i32
  }
  func.func @transform_3(%arg0: i32) -> (i32, i32) {
    %c0_i32 = arith.constant 0 : i32
    %c0_i32_0 = arith.constant 0 : i32
    %c0_i32_1 = arith.constant 0 : i32
    return %c0_i32, %c0_i32_0 : i32, i32
  }
  func.func @transform_4(%arg0: i32) -> (i32, i32) {
    %c0_i32 = arith.constant 0 : i32
    %c0_i32_0 = arith.constant 0 : i32
    %c0_i32_1 = arith.constant 0 : i32
    return %c0_i32, %c0_i32_0 : i32, i32
  }
  func.func @transform_5(%arg0: i32) -> (i32, i32) {
    %c0_i32 = arith.constant 0 : i32
    %c0_i32_0 = arith.constant 0 : i32
    %c0_i32_1 = arith.constant 0 : i32
    return %c0_i32, %c0_i32_0 : i32, i32
  }
  func.func @transform_6(%arg0: i32) -> (i32, i32) {
    %c0_i32 = arith.constant 0 : i32
    %c0_i32_0 = arith.constant 0 : i32
    %c0_i32_1 = arith.constant 0 : i32
    return %c0_i32, %c0_i32_0 : i32, i32
  }
  func.func @transform_7(%arg0: i32) -> (i32, i32) {
    %c0_i32 = arith.constant 0 : i32
    %c0_i32_0 = arith.constant 0 : i32
    return %arg0, %c0_i32 : i32, i32
  }
  func.func @transform_8(%arg0: i32) -> (i32, i32) {
    %c0_i32 = arith.constant 0 : i32
    %c0_i32_0 = arith.constant 0 : i32
    return %arg0, %c0_i32 : i32, i32
  }
}

</mosaic_0001>

<bundles_post_ra>
// kernel: tpu_custom_call.1
= control target key start
LH: loop header
LB: loop body
LE: loop exit
PB: predicated region body
PF: predicated region fallthrough
CT: control target
= control target key end

     0   :  { %s2130_s0 = inlined_call_operand.vmem [shape: f32[16,128], index: 0, kind: input, shape index: {}]   ;;  %s2131_s1 = inlined_call_operand.hbm [shape: f32[16,128], index: 1, kind: input, shape index: {}, may-alias: {1,7}]   ;;  %s2132_s2 = inlined_call_operand.vmem [shape: f32[16,128], index: 2, kind: input, shape index: {}]   ;;  %s2133_s3 = inlined_call_operand.hbm [shape: f32[128,128], index: 3, kind: input, shape index: {}]   ;;  %s2134_s4 = inlined_call_operand.hbm [shape: f32[128,256], index: 4, kind: input, shape index: {}]   ;;  %s2135_s5 = inlined_call_operand.hbm [shape: f32[256,128], index: 5, kind: input, shape index: {}]   ;;  %s2136_s6 = inlined_call_operand.hbm [shape: f32[128,256], index: 6, kind: input, shape index: {}]   ;;  %s2137_s7 = inlined_call_operand.hbm [shape: f32[16,128], index: 7, kind: output, shape index: {0}, may-alias: {1,7}]   ;;  %s2138_s8 = inlined_call_operand.hbm [shape: f32[16,128], index: 8, kind: output, shape index: {1}]  }
   0x1   :  { %2143 = sst [smem:[#allocation19_spill]] %s2130_s0 }
   0x2   :  { %2144 = sst [smem:[#allocation20_spill]] %s2133_s3 }
   0x3   :  { %14 = vsyncpa [#allocation3], 0 }
   0x4   :  { %16 = vsyncpa [#allocation3 + $0x1], 0 }
   0x5   :  { %17 = vsyncpa [#allocation6], 0 }
   0x6   :  { %18 = vsyncpa [#allocation9], 0 }
   0x7   :  { %19 = vsyncpa [#allocation4], 0 }
   0x8   :  { %21 = vsyncpa [#allocation4 + $0x1], 0 }
   0x9   :  { %22 = vsyncpa [#allocation13], 0 }
   0xa   :  { %24 = vsyncpa [#allocation13 + $0x1], 0  ;;  %s1756_s27 = smov 0   ;;  %s1758_s28 = smov 0  }
   0xb   :  { %s1760_s29 = smov 0   ;;  %s1762_s30 = smov 0  }
   0xc LB: > { %s1697_s9 = smov [#allocation5]   ;;  %s1777_s11 = sadd.s32 4294967295, %s1695_s30   ;;  %s1695_s30 = sphi %s1762_s30, %s2169_s30   ;;  %s1691_s29 = sphi %s1760_s29, %s2168_s29   ;;  %s1687_s28 = sphi %s1758_s28, %s2167_s28   ;;  %s1683_s27 = sphi %s1756_s27, %s2166_s27  }
   0xd   : > { %s261_s10 = sshll.u32 %s1697_s9, 4  ;;  %p1105_p0 = scmp.ge.s32.totalorder %s1695_s30, 1  ;;  %s1782_s10 = int_to_ptr.vmem [resolvable:$true] %s261_s10 }
   0xe   : > { %p2139_p1 = scmp.eq.s32.totalorder %s1777_s11, 0  ;;  %p249_p2 = scmp.lt.s32.totalorder %s1695_s30, 3 }
   0xf   : > { %s1698_s13 = smov [#allocation8]   ;;  %s1699_s16 = smov [#allocation7]  }
  0x10   : > { %p1784_p3 = pnand %p1105_p0, %p249_p2  ;;  %s287_s14 = sshll.u32 %s1698_s13, 4  ;;  %s1797_s14 = int_to_ptr.vmem [resolvable:$true] %s287_s14 }
  0x11   : > { %s274_s17 = sshll.u32 %s1699_s16, 4  ;;  %s2147_s3 = sld [smem:[#allocation20_spill]]  ;;  %s1799_s17 = int_to_ptr.vmem [resolvable:$true] %s274_s17 }
  0x12   : > { %s2145_s12 = scalar_select %p1784_p3, 1, 0 }
  0x13   : > { %p1360_p5 = pneg %p1784_p3 }
  0x15   : > { %p1793_p6 = pnand %p1360_p5, %p2139_p1 }
  0x17   : > { %s1447_s20 = scalar_lea.hbm %s2147_s3, 2048  ;;  %p1809_p8 = pneg %p1793_p6 }
  0x18   : > { %p1448_p7 = scmp.ne.s32.totalorder %s2147_s3, %s1447_s20  ;;  %p1454_p11 = scmp.lt.u32.totalorder %s1447_s20, %s2147_s3 }
  0x1a   : > { %p1450_p9 = pnand %p1809_p8, %p1448_p7 }
  0x1c   : > { %p1451_p10 = pneg %p1450_p9 }
  0x1e   : > { %p1456_p12 = pnand %p1454_p11, %p1451_p10 }
  0x20   : > { %1459 = shalt.err (!%p1456_p12)
}
  0x21   : > { %s1460_s26 = scalar_lea.vmem %s1782_s10, 2048  ;;  %p1468_p5 = scmp.lt.s32.totalorder %s1782_s10, %s1782_s10 }
  0x22   : > { %p1461_p13 = scmp.ne.s32.totalorder %s1782_s10, %s1460_s26  ;;  %p1469_p4 = scmp.lt.s32.totalorder %s1460_s26, %s1460_s26 }
  0x24   : > { %p1463_p0 = pnand %p1461_p13, %p1809_p8  ;;  %p1470_p7 = por %p1469_p4, %p1468_p5 }
  0x26   : > { %p1464_p2 = pneg %p1463_p0 }
  0x28   : > { %p1471_p9 = pnand %p1470_p7, %p1464_p2 }
  0x2a   : > { %1474 = shalt.err (!%p1471_p9)
}
  0x2b   : > { %s1700_s9 = smov 128   ;;  %s1701_s13 = smov 8  }
  0x2c   : > { %1363 = dma.hbm_to_vmem [thread:$0]  (!%p1793_p6), %s2147_s3, 2048, %s1782_s10, [#allocation6], %s1700_s9, %s1700_s9, %s1701_s13  }
  0x2d   : > { %s1475_s21 = scalar_lea.hbm %s2135_s5, 4096 }
  0x2e   : > { %p1476_p4 = scmp.ne.s32.totalorder %s2135_s5, %s1475_s21  ;;  %p1482_p12 = scmp.lt.u32.totalorder %s1475_s21, %s2135_s5 }
  0x30   : > { %p1478_p10 = pnand %p1476_p4, %p1809_p8 }
  0x32   : > { %p1479_p11 = pneg %p1478_p10 }
  0x34   : > { %p1484_p13 = pnand %p1482_p12, %p1479_p11 }
  0x36   : > { %1487 = shalt.err (!%p1484_p13)
}
  0x37   : > { %s1488_s10 = scalar_lea.vmem %s1797_s14, 4096  ;;  %p1496_p7 = scmp.lt.s32.totalorder %s1797_s14, %s1797_s14 }
  0x38   : > { %p1489_p0 = scmp.ne.s32.totalorder %s1797_s14, %s1488_s10  ;;  %p1497_p9 = scmp.lt.s32.totalorder %s1488_s10, %s1488_s10 }
  0x3a   : > { %p1491_p2 = pnand %p1489_p0, %p1809_p8  ;;  %p1498_p4 = por %p1497_p9, %p1496_p7 }
  0x3c   : > { %p1492_p5 = pneg %p1491_p2 }
  0x3e   : > { %p1499_p10 = pnand %p1498_p4, %p1492_p5 }
  0x40   : > { %1502 = shalt.err (!%p1499_p10)
}
  0x41   : > { %1369 = dma.hbm_to_vmem [thread:$0]  (!%p1793_p6), %s2135_s5, 4096, %s1797_s14, [#allocation9], %s1700_s9, %s1700_s9, %s1701_s13  }
  0x42   : > { %s1503_s21 = scalar_lea.hbm %s2134_s4, 4096 }
  0x43   : > { %p1504_p11 = scmp.ne.s32.totalorder %s2134_s4, %s1503_s21  ;;  %p1510_p0 = scmp.lt.u32.totalorder %s1503_s21, %s2134_s4 }
  0x45   : > { %p1506_p12 = pnand %p1504_p11, %p1809_p8 }
  0x47   : > { %p1507_p13 = pneg %p1506_p12 }
  0x49   : > { %p1512_p2 = pnand %p1510_p0, %p1507_p13 }
  0x4b   : > { %1515 = shalt.err (!%p1512_p2)
}
  0x4c   : > { %s1516_s14 = scalar_lea.vmem %s1799_s17, 4096  ;;  %p1524_p4 = scmp.lt.s32.totalorder %s1799_s17, %s1799_s17 }
  0x4d   : > { %p1517_p5 = scmp.ne.s32.totalorder %s1799_s17, %s1516_s14  ;;  %p1525_p10 = scmp.lt.s32.totalorder %s1516_s14, %s1516_s14 }
  0x4f   : > { %p1519_p7 = pnand %p1517_p5, %p1809_p8  ;;  %p1526_p11 = por %p1525_p10, %p1524_p4 }
  0x51   : > { %p1520_p9 = pneg %p1519_p7 }
  0x53   : > { %p1527_p12 = pnand %p1526_p11, %p1520_p9 }
  0x55   : > { %1530 = shalt.err (!%p1527_p12)
}
  0x56   : > { %s1702_s9 = smov 256   ;;  %s1703_s13 = smov 16  }
  0x57   : > { %1366 = dma.hbm_to_vmem [thread:$0]  (!%p1793_p6), %s2134_s4, 4096, %s1799_s17, [#allocation6], %s1702_s9, %s1702_s9, %s1703_s13  }
  0x58   : > { %s1704_s18 = smov [#allocation10]   ;;  %s1531_s22 = scalar_lea.hbm %s2136_s6, 4096 }
  0x59   : > { %s300_s19 = sshll.u32 %s1704_s18, 4  ;;  %p1532_p13 = scmp.ne.s32.totalorder %s2136_s6, %s1531_s22  ;;  %s301_s19 = int_to_ptr.vmem [resolvable:$true] %s300_s19 }
  0x5a   : > { %p1538_p5 = scmp.lt.u32.totalorder %s1531_s22, %s2136_s6 }
  0x5b   : > { %p1534_p0 = pnand %p1532_p13, %p1809_p8 }
  0x5d   : > { %p1535_p2 = pneg %p1534_p0 }
  0x5f   : > { %p1540_p7 = pnand %p1538_p5, %p1535_p2 }
  0x61   : > { %1543 = shalt.err (!%p1540_p7)
}
  0x62   : > { %s1544_s17 = scalar_lea.vmem %s301_s19, 4096  ;;  %p1552_p11 = scmp.lt.s32.totalorder %s301_s19, %s301_s19 }
  0x63   : > { %p1545_p9 = scmp.ne.s32.totalorder %s301_s19, %s1544_s17  ;;  %p1553_p12 = scmp.lt.s32.totalorder %s1544_s17, %s1544_s17 }
  0x65   : > { %p1547_p4 = pnand %p1545_p9, %p1809_p8  ;;  %p1554_p1 = por %p1553_p12, %p1552_p11 }
  0x67   : > { %p1548_p10 = pneg %p1547_p4 }
  0x69   : > { %p1555_p3 = pnand %p1554_p1, %p1548_p10 }
  0x6b   : > { %1558 = shalt.err (!%p1555_p3)
}
  0x6c   : > { %1372 = dma.hbm_to_vmem [thread:$0]  (!%p1793_p6), %s2136_s6, 4096, %s301_s19, [#allocation9], %s1702_s9, %s1702_s9, %s1703_s13  }
  0x6d   : > { %s1104_s23 = sadd.s32 4294967294, %s1695_s30   ;;  %s1896_s15 = sadd.s32 1, %s1695_s30  }
  0x6e   : > { %s60_s18 = ssub.s32 %s1695_s30, %s1896_s15  ;;  %s63_s20 = sadd.s32 1, %s1691_s29 }
  0x6f   : > { %p61_p1 = scmp.eq.s32.totalorder %s60_s18, 0  ;;  %p70_p3 = scmp.ne.s32.totalorder %s1691_s29, %s1687_s28 }
  0x70   : > { %p71_p8 = scmp.eq.s32.totalorder %s1695_s30, 0  ;;  %p76_p13 = scmp.ne.s32.totalorder %s1687_s28, %s1683_s27 }
  0x71   : > { %s1907_s21 = scalar_select %p61_p1, %s1691_s29, %s63_s20  }
  0x72   : > { %p1909_p0 = por %p71_p8, %p70_p3  ;;  %p2150_p2 = scmp.eq.s32.totalorder %s1777_s11, 0 }
  0x73   : > { %p210_p5 = scmp.eq.s32.totalorder %s1777_s11, 1  ;;  %p216_p7 = scmp.eq.s32.totalorder %s1104_s23, 1 }
  0x74   : > { %p1915_p6 = por %p2150_p2, %p76_p13  ;;  %p1388_p9 = scmp.lt.s32.totalorder %s1695_s30, 2 }
  0x75   : > { %s321_s13 = sand.u32 1, %s1691_s29   ;;  %p1922_p4 = por %p210_p5, %p70_p3 }
  0x76   : > { %p1926_p10 = por %p216_p7, %p76_p13  ;;  %s1111_s25 = sshll.u32 %s321_s13, 3 }
  0x77   : > { %s2152_s19 = scalar_select %p1922_p4, 1, 0 }
  0x78   : > { %s2153_s24 = scalar_select %p1926_p10, 1, 0 }
  0x79   : > { %s1112_s26 = sshll.u32 %s1695_s30, 7  ;;  %s325_s16 = scalar_lea.vmem [#allocation2], %s1111_s25 }
  0x7a   : > { %s1934_s10 = scalar_lea.hbm %s2131_s1, %s1112_s26  ;;  %s332_s23 = sshll.u32 %s325_s16, 4  ;;  %s1936_s23 = int_to_ptr.vmem [resolvable:$true] %s332_s23 }
  0x7b   : > { %p1940_p11 = pnand %p1388_p9, %p1909_p0  ;;  %s322_s20 = scalar_lea.sflag [#allocation3], %s321_s13 }
  0x7c   : > { %s1559_s3 = scalar_lea.hbm %s1934_s10, 128  ;;  %s1564_s14 = scalar_lea.hbm %s2131_s1, 256 }
  0x7d   : > { %p1560_p12 = scmp.ne.s32.totalorder %s1934_s10, %s1559_s3  ;;  %p1561_p1 = pneg %p1940_p11 }
  0x7e   : > { %p1565_p13 = scmp.lt.u32.totalorder %s1934_s10, %s2131_s1  ;;  %p1566_p0 = scmp.lt.u32.totalorder %s1564_s14, %s1559_s3 }
  0x7f   : > { %p1562_p3 = pnand %p1561_p1, %p1560_p12  ;;  %p1568_p5 = scmp.lt.u32.totalorder %s1559_s3, %s1934_s10 }
  0x80   : > { %p1567_p2 = por %p1566_p0, %p1565_p13 }
  0x81   : > { %p1563_p8 = pneg %p1562_p3 }
  0x82   : > { %p1569_p7 = por %p1568_p5, %p1567_p2 }
  0x84   : > { %p1570_p9 = pnand %p1569_p7, %p1563_p8 }
  0x86   : > { %1573 = shalt.err (!%p1570_p9)
}
  0x87   : > { %s1574_s13 = scalar_lea.vmem %s1936_s23, 128  ;;  %s1705_s16 = smov [#allocation2]  }
  0x88   : > { %p1575_p12 = scmp.ne.s32.totalorder %s1936_s23, %s1574_s13  ;;  %s1579_s25 = sshll.u32 %s1705_s16, 4  ;;  %s1580_s25 = int_to_ptr.vmem [resolvable:$false] %s1579_s25 }
  0x89   : > { %s1581_s26 = scalar_lea.vmem %s1580_s25, 256  ;;  %p1582_p4 = scmp.lt.s32.totalorder %s1936_s23, %s1580_s25 }
  0x8a   : > { %p1577_p3 = pnand %p1575_p12, %p1561_p1  ;;  %p1583_p13 = scmp.lt.s32.totalorder %s1581_s26, %s1574_s13 }
  0x8c   : > { %p1578_p10 = pneg %p1577_p3  ;;  %p1584_p0 = por %p1583_p13, %p1582_p4 }
  0x8e   : > { %p1585_p2 = pnand %p1584_p0, %p1578_p10 }
  0x90   : > { %1588 = shalt.err (!%p1585_p2)
}
  0x91   : > { %1376 = dma.hbm_to_vmem [thread:$0]  (!%p1940_p11), %s1934_s10, 128, %s1936_s23, %s322_s20  }
  0x92   : > { %p2155_p8 = scmp.ne.s32.totalorder %s2145_s12, 0 }
  0x93   : > { %s1972_s3 = sand.u32 (!%p2155_p8), 1, %s1687_s28  }
  0x94   : > { %348 = sbr.rel (%p2155_p8) target bundleno = 2210 (0x8a2), region = 48  ;;  %s1975_s14 = sshll.u32 (!%p2155_p8), %s1972_s3, 3 }
  0x95   : > { %s351_s22 = scalar_lea.sflag (!%p2155_p8), [#allocation3], %s1972_s3 }
  0x9b   : > { %1662 = dma.done.wait (%p1915_p6), %s351_s22, 128  }
  0x9c   : > { %1664 = vsyncadd (%p1915_p6), %s351_s22, 4294967168  ;;  %p2156_p4 = scmp.eq.s32.totalorder %s1777_s11, 0 }
  0x9e   : > { %1666 = dma.done.wait (%p2156_p4), [#allocation6], 6144   ;;  %p2157_p10 = pmov %p2156_p4 }
  0x9f   : > { %p2158_p11 = pmov %p2156_p4 }
  0xa0   : > { %1668 = vsyncadd (%p2157_p10), [#allocation6], 4294961152 }
  0xa1   : > { %1670 = dma.done.wait (%p2158_p11), [#allocation9], 8192   ;;  %p2159_p1 = pmov %p2156_p4 }
  0xa2   : > { %v1706_v0 = vmov 0.0|0.0   ;;  %vm1707_vm0 = vmmov 0   ;;  %v1708_v1 = vmov 0.0   ;;  %v426_v2 = vld [vmem:[#allocation5] sm:$0xff]  ;;  %v427_v3 = vld [vmem:[#allocation5 + $0x8] sm:$0xff]  ;;  %v428_v4 = vld [vmem:[#allocation5 + $0x10] sm:$0xff]  ;;  %v513_v27 = vlaneseq }
  0xa3   : > { %1672 = vsyncadd (%p2159_p1), [#allocation9], 4294959104  ;;  %1218 = vmatprep.subr.bf16.mxu0 %v1706_v0  ;;  %1215 = vmatprep.mubr.msk.f32.mxu0 %vm1707_vm0, %v1708_v1  ;;  %v1219_v5 = vpack.c.bf16 %v427_v3, %v426_v2  ;;  %v429_v6 = vld [vmem:[#allocation5 + $0x18] sm:$0xff]  ;;  %v430_v8 = vld [vmem:[#allocation5 + $0x20] sm:$0xff]  ;;  %p416_p6 = scmp.lt.s32.totalorder %s1777_s11, 1  ;;  %s415_s20 = scalar_lea.vmem [#allocation12], %s1975_s14 }
  0xa4   : > { %674 = vmatprep.mubr.f32.mxu1 %v1708_v1  ;;  %v1222_v7 = vpack.c.bf16 %v429_v6, %v428_v4  ;;  %v431_v9 = vld [vmem:[#allocation5 + $0x28] sm:$0xff]  ;;  %v432_v11 = vld [vmem:[#allocation5 + $0x30] sm:$0xff]  ;;  %v433_v12 = vld [vmem:[#allocation5 + $0x38] sm:$0xff]  ;;  %v2004_v28 = vand.u32 127, %v513_v27  ;;  %s2160_s0 = sld [smem:[#allocation19_spill]]  ;;  %s940_s26 = sshll.u32 %s415_s20, 4  ;;  %s2054_s26 = int_to_ptr.vmem [resolvable:$true] %s940_s26 }
  0xa5   : > { %1220 = vmatpush3.bf16.msra.mxu0 %v1219_v5  ;;  %v1225_v10 = vpack.c.bf16 %v431_v9, %v430_v8  ;;  %v1228_v13 = vpack.c.bf16 %v433_v12, %v432_v11  ;;  %v434_v14 = vld [vmem:[#allocation5 + $0x40] sm:$0xff]  ;;  %v435_v15 = vld [vmem:[#allocation5 + $0x48] sm:$0xff]  ;;  %v436_v17 = vld [vmem:[#allocation5 + $0x50] sm:$0xff]  ;;  %s1995_s12 = scalar_select %p416_p6, %s1777_s11, 1 }
  0xa6   : > { %1221 = vmatprep.subr.bf16.mxu0 %v1706_v0  ;;  %v1231_v16 = vpack.c.bf16 %v435_v15, %v434_v14  ;;  %v437_v18 = vld [vmem:[#allocation5 + $0x58] sm:$0xff]  ;;  %v438_v20 = vld [vmem:[#allocation5 + $0x60] sm:$0xff]  ;;  %v439_v21 = vld [vmem:[#allocation5 + $0x68] sm:$0xff]  ;;  %vm515_vm1 = vcmp.lt.s32.totalorder %v2004_v28, 8  ;;  %s2142_s22 = sshll.u32 %s1777_s11, 7  ;;  %s914_s23 = scalar_lea.sflag [#allocation13], %s1972_s3 }
  0xa7   : > { %v1234_v19 = vpack.c.bf16 %v437_v18, %v436_v17  ;;  %v1237_v22 = vpack.c.bf16 %v439_v21, %v438_v20  ;;  %v440_v23 = vld [vmem:[#allocation5 + $0x70] sm:$0xff]  ;;  %v441_v24 = vld [vmem:[#allocation5 + $0x78] sm:$0xff]  ;;  %s1121_s9 = sshll.u32 %s1995_s12, 3  ;;  %v682_v63 = vld [vmem:[#allocation7 + $0x8] sm:$0xff]  ;;  %s938_s10 = scalar_lea.hbm %s2138_s8, %s2142_s22 }
  0xa8   : > { %v1240_v25 = vpack.c.bf16 %v441_v24, %v440_v23  ;;  %s423_s18 = scalar_lea.vmem %s2132_s2, %s1121_s9  ;;  %v681_v2 = vld [vmem:[#allocation7] sm:$0xff]  ;;  %v683_v4 = vld [vmem:[#allocation7 + $0x10] sm:$0xff]  ;;  %v686_v5 = vld [vmem:[#allocation7 + $0x28] sm:$0xff]  ;;  %p2161_p7 = scmp.ne.s32.totalorder %s2152_s19, 0 }
  0xa9   : > { %1223 = vmatpush3.bf16.msra.mxu0 %v1222_v7  ;;  %v425_v26 = vld [vmem:[%s423_s18] sm:$0xff]  ;;  %v688_v6 = vld [vmem:[#allocation7 + $0x38] sm:$0xff]  ;;  %v1276_v7 = vpack.c.bf16 %v683_v4, %v681_v2  ;;  %v685_v9 = vld [vmem:[#allocation7 + $0x20] sm:$0xff]  ;;  %s1589_s18 = scalar_lea.vmem %s2054_s26, 128  ;;  %s1709_s13 = smov [#allocation12]  }
  0xaa   : > { %1224 = vmatprep.subr.bf16.mxu0 %v1706_v0  ;;  %v1278_v8 = vpack.c.bf16 %v688_v6, %v686_v5  ;;  %v690_v11 = vld [vmem:[#allocation7 + $0x48] sm:$0xff]  ;;  %v692_v12 = vld [vmem:[#allocation7 + $0x58] sm:$0xff]  ;;  %v689_v15 = vld [vmem:[#allocation7 + $0x40] sm:$0xff]  ;;  %s419_s25 = scalar_lea.vmem %s2160_s0, %s1121_s9  ;;  %p1590_p5 = scmp.ne.s32.totalorder %s2054_s26, %s1589_s18 }
  0xab   : > { %v1282_v14 = vpack.c.bf16 %v692_v12, %v690_v11  ;;  %v694_v17 = vld [vmem:[#allocation7 + $0x68] sm:$0xff]  ;;  %v696_v18 = vld [vmem:[#allocation7 + $0x78] sm:$0xff]  ;;  %v693_v21 = vld [vmem:[#allocation7 + $0x60] sm:$0xff]  ;;  %s1593_s16 = sshll.u32 %s1709_s13, 4  ;;  %s1594_s16 = int_to_ptr.vmem [resolvable:$false] %s1593_s16 }
  0xac   : > { %v1286_v20 = vpack.c.bf16 %v696_v18, %v694_v17  ;;  %v698_v23 = vld [vmem:[#allocation7 + $0x88] sm:$0xff]  ;;  %v700_v24 = vld [vmem:[#allocation7 + $0x98] sm:$0xff]  ;;  %v592_v2 = vld [vmem:[#allocation10 + $0x70] sm:$0xff]  ;;  %p1591_p9 = pnand %p1590_p5, %p2161_p7  ;;  %p1596_p3 = scmp.lt.s32.totalorder %s2054_s26, %s1594_s16 }
  0xad   : > { %1226 = vmatpush3.bf16.msra.mxu0 %v1225_v10  ;;  %v687_v10 = vld [vmem:[#allocation7 + $0x30] sm:$0xff]  ;;  %v579_v27 = vld [vmem:[#allocation10 + $0x8] sm:$0xff]  ;;  %v597_v6 = vld [vmem:[#allocation10 + $0x98] sm:$0xff] }
  0xae   : > { %1227 = vmatprep.subr.bf16.mxu0 %v1706_v0  ;;  %v707_v4 = vld [vmem:[#allocation7 + $0xd0] sm:$0xff]  ;;  %v595_v5 = vld [vmem:[#allocation10 + $0x88] sm:$0xff]  ;;  %v594_v12 = vld [vmem:[#allocation10 + $0x80] sm:$0xff]  ;;  %p1592_p12 = pneg %p1591_p9 }
  0xaf   : > { %v1258_v11 = vpack.c.bf16 %v597_v6, %v595_v5  ;;  %v827_v5 = vld [vmem:[#allocation8 + $0xb8] sm:$0xff] }
  0xb1   : > { %1229 = vmatpush3.bf16.msra.mxu0 %v1228_v13  ;;  %v1280_v13 = vpack.c.bf16 %v687_v10, %v685_v9 }
  0xb2   : > { %1230 = vmatprep.subr.bf16.mxu0 %v1706_v0 }
  0xb5   : > { %1232 = vmatpush3.bf16.msra.mxu0 %v1231_v16  ;;  %v691_v16 = vld [vmem:[#allocation7 + $0x50] sm:$0xff] }
  0xb6   : > { %1233 = vmatprep.subr.bf16.mxu0 %v1706_v0 }
  0xb9   : > { %1235 = vmatpush3.bf16.msra.mxu0 %v1234_v19  ;;  %v1284_v19 = vpack.c.bf16 %v691_v16, %v689_v15  ;;  %v709_v15 = vld [vmem:[#allocation7 + $0xe0] sm:$0xff]  ;;  %v711_v16 = vld [vmem:[#allocation7 + $0xf0] sm:$0xff] }
  0xba   : > { %1236 = vmatprep.subr.bf16.mxu0 %v1706_v0  ;;  %v1304_v18 = vpack.c.bf16 %v711_v16, %v709_v15  ;;  %v813_v15 = vld [vmem:[#allocation8 + $0x48] sm:$0xff]  ;;  %v830_v16 = vld [vmem:[#allocation8 + $0xd0] sm:$0xff] }
  0xbd   : > { %1238 = vmatpush3.bf16.msra.mxu0 %v1237_v22  ;;  %v695_v22 = vld [vmem:[#allocation7 + $0x70] sm:$0xff] }
  0xbe   : > { %1239 = vmatprep.subr.bf16.mxu0 %v1706_v0  ;;  %v684_v0 = vld [vmem:[#allocation7 + $0x18] sm:$0xff] }
  0xbf   : > { %v1274_v3 = vpack.c.bf16 %v684_v0, %v682_v63  ;;  %v590_v0 = vld [vmem:[#allocation10 + $0x60] sm:$0xff] }
  0xc0   : > { %v1256_v9 = vpack.c.bf16 %v592_v2, %v590_v0  ;;  %v808_v2 = vld [vmem:[#allocation8 + $0x20] sm:$0xff] }
  0xc1   : > { %1241 = vmatpush3.bf16.msra.mxu0 %v1240_v25  ;;  %v697_v25 = vld [vmem:[#allocation7 + $0x80] sm:$0xff] }
  0xc2   : > { %1275 = vmatprep.subr.bf16.mxu0 %v1274_v3 }
  0xc4   : > { %1216 = vmatmul.mubr.f32.vlgmr.msra.gmra.mrb[0].mxu0 %v425_v26  ;;  %v699_v26 = vld [vmem:[#allocation7 + $0x90] sm:$0xff] }
  0xc5   : > { %777 = vmatprep.mubr.f32.mxu0 %v1708_v1  ;;  %1277 = vmatpush1.bf16.msra.mxu0 %v1276_v7  ;;  %v710_v7 = vld [vmem:[#allocation7 + $0xe8] sm:$0xff] }
  0xc6   : > { %1279 = vmatprep.subr.bf16.mxu0 %v1278_v8  ;;  %v712_v8 = vld [vmem:[#allocation7 + $0xf8] sm:$0xff] }
  0xc9   : > { %1281 = vmatpush1.bf16.msra.mxu0 %v1280_v13  ;;  %v596_v13 = vld [vmem:[#allocation10 + $0x90] sm:$0xff] }
  0xca   : > { %1283 = vmatprep.subr.bf16.mxu0 %v1282_v14  ;;  %v1302_v14 = vpack.c.bf16 %v712_v8, %v710_v7  ;;  %v1260_v17 = vpack.c.bf16 %v596_v13, %v594_v12  ;;  %v810_v8 = vld [vmem:[#allocation8 + $0x30] sm:$0xff] }
  0xcd   : > { %1285 = vmatpush1.bf16.msra.mxu0 %v1284_v19  ;;  %v424_v19 = vld [vmem:[%s419_s25] sm:$0xff] }
  0xce   : > { %1287 = vmatprep.subr.bf16.mxu0 %v1286_v20 }
 0x197   : > { %v508_v29 = vpop.f32.mrb[0].mxu0 }
 0x198   : > { %512 = vst [vmem:[%s415_s20] sm:$0xff] %v508_v29  ;;  %v1217_v30 = vpop.f32.mrb[1].mxu0  ;;  %v516_v31 = vsel %vm515_vm1, %v508_v29, -inf  ;;  %v581_v29 = vld [vmem:[#allocation10 + $0x18] sm:$0xff]  ;;  %s1595_s20 = scalar_lea.vmem %s1594_s16, 256 }
 0x199   : > { %517 = vmax.xlane.f32.xlu0 %v516_v31  ;;  %v578_v30 = vld [vmem:[#allocation10] sm:$0xff]  ;;  %p1597_p13 = scmp.lt.s32.totalorder %s1595_s20, %s1589_s18 }
 0x19b   : > { %p1598_p0 = por %p1597_p13, %p1596_p3 }
 0x19d   : > { %p1599_p2 = pnand %p1598_p0, %p1592_p12 }
 0x226   : > { %v518_v32 = vpop.xlane.xlu0 %517 }
 0x227   : > { %v519_v33 = vsub.f32 %v516_v31, %v518_v32  ;;  %v1288_v31 = vpack.c.bf16 %v695_v22, %v693_v21  ;;  %v1242_v32 = vpack.c.bf16 %v581_v29, %v579_v27  ;;  %v599_v29 = vld [vmem:[#allocation10 + $0xa8] sm:$0xff] }
 0x229   : > { %v520_v34 = vmul.f32 1.442695, %v519_v33  ;;  %v580_v33 = vld [vmem:[#allocation10 + $0x10] sm:$0xff]  ;;  %1243 = vmatprep.subr.bf16.mxu1 %v1242_v32  ;;  %1289 = vmatpush1.bf16.msra.mxu0 %v1288_v31  ;;  %v598_v32 = vld [vmem:[#allocation10 + $0xa0] sm:$0xff] }
 0x22b   : > { %1437 = vpow2.f32 %v520_v34  ;;  %v583_v34 = vld [vmem:[#allocation10 + $0x28] sm:$0xff] }
 0x235   : > { %v1438_v35 = vpop.eup %1437 }
 0x236   : > { %522 = vadd.xlane.f32.xlu0 %v1438_v35 }
 0x2c3   : > { %v523_v36 = vpop.xlane.xlu0 %522 }
 0x2c4   : > { %1439 = vrcp.f32 %v523_v36  ;;  %v1290_v36 = vpack.c.bf16 %v700_v24, %v698_v23 }
 0x2c6   : > { %1291 = vmatprep.subr.bf16.mxu0 %v1290_v36  ;;  %v602_v36 = vld [vmem:[#allocation10 + $0xc0] sm:$0xff] }
 0x2ce   : > { %v1440_v37 = vpop.eup %1439 }
 0x2cf   : > { %v2012_v38 = vmul.f32 %v1440_v37, %v1438_v35  ;;  %v585_v35 = vld [vmem:[#allocation10 + $0x38] sm:$0xff]  ;;  %v1244_v37 = vpack.c.bf16 %v580_v33, %v578_v30  ;;  %v600_v33 = vld [vmem:[#allocation10 + $0xb0] sm:$0xff] }
 0x2d0   : > { %v601_v30 = vld [vmem:[#allocation10 + $0xb8] sm:$0xff] }
 0x2d1   : > { %v526_v39 = vsel %vm515_vm1, %v2012_v38, -inf  ;;  %1245 = vmatpush1.bf16.msra.mxu1 %v1244_v37  ;;  %v1262_v31 = vpack.c.bf16 %v601_v30, %v599_v29  ;;  %v834_v30 = vld [vmem:[#allocation8 + $0xf0] sm:$0xff] }
 0x2d2   : > { %527 = vmax.xlane.f32.xlu1 %v526_v39 }
 0x35f   : > { %v528_v40 = vpop.xlane.xlu1 %527 }
 0x360   : > { %vm529_vm2 = vcmp.eq.f32.partialorder %v526_v39, %v528_v40  ;;  %v582_v40 = vld [vmem:[#allocation10 + $0x20] sm:$0xff] }
 0x361   : > { %v530_v41 = vsel %vm529_vm2, %v2004_v28, 128 }
 0x362   : > { %v532_v42 = vshra.s32 %v530_v41, 16  ;;  %v531_v44 = vand.u32 65535, %v530_v41  ;;  %v584_v41 = vld [vmem:[#allocation10 + $0x30] sm:$0xff] }
 0x364   : > { %v534_v43 = vcvt.s32.f32 %v532_v42  ;;  %v533_v46 = vcvt.s32.f32 %v531_v44  ;;  %v587_v42 = vld [vmem:[#allocation10 + $0x48] sm:$0xff]  ;;  %v704_v44 = vld [vmem:[#allocation7 + $0xb8] sm:$0xff] }
 0x366   : > { %535 = vmin.xlane.f32.xlu1 %v534_v43 }
 0x3f3   : > { %v536_v45 = vpop.xlane.xlu1 %535 }
 0x3f4   : > { %vm537_vm3 = vcmp.eq.f32.partialorder %v534_v43, %v536_v45  ;;  %v542_v48 = vcvt.f32.s32 %v536_v45  ;;  %v702_v43 = vld [vmem:[#allocation7 + $0xa8] sm:$0xff]  ;;  %v589_v45 = vld [vmem:[#allocation10 + $0x58] sm:$0xff] }
 0x3f5   : > { %v538_v47 = vsel %vm537_vm3, %v533_v46, inf  ;;  %v1248_v46 = vpack.c.bf16 %v584_v41, %v582_v40  ;;  %v609_v40 = vld [vmem:[#allocation10 + $0xf8] sm:$0xff]  ;;  %v608_v41 = vld [vmem:[#allocation10 + $0xf0] sm:$0xff] }
 0x3f6   : > { %539 = vmin.xlane.f32.xlu0 %v538_v47  ;;  %v543_v50 = vshll.u32 %v542_v48, 16  ;;  %v1292_v47 = vpack.c.bf16 %v699_v26, %v697_v25  ;;  %v701_v48 = vld [vmem:[#allocation7 + $0xa0] sm:$0xff] }
 0x3f8   : > { %1293 = vmatpush1.bf16.msra.mxu0 %v1292_v47 }
 0x483   : > { %v540_v49 = vpop.xlane.xlu0 %539 }
 0x484   : > { %v541_v51 = vcvt.f32.s32 %v540_v49  ;;  %v1250_v49 = vpack.c.bf16 %v589_v45, %v587_v42 }
 0x486   : > { %v544_v52 = vadd.s32 %v543_v50, %v541_v51  ;;  %v586_v50 = vld [vmem:[#allocation10 + $0x40] sm:$0xff]  ;;  %v588_v51 = vld [vmem:[#allocation10 + $0x50] sm:$0xff] }
 0x488   : > { %vm545_vm4 = vcmp.eq.s32.totalorder %v2004_v28, %v544_v52  ;;  %v1294_v52 = vpack.c.bf16 %v704_v44, %v702_v43  ;;  %v820_v43 = vld [vmem:[#allocation8 + $0x80] sm:$0xff]  ;;  %v821_v44 = vld [vmem:[#allocation8 + $0x88] sm:$0xff] }
 0x489   : > { %v2020_v53 = vsel %vm545_vm4, 1.0, %v1708_v1  ;;  %v1306_v45 = vpack.c.bf16 %v821_v44, %v820_v43 }
 0x48a   : > { %vm549_vm5 = vcmp.gt.f32.partialorder %v2020_v53, 0.0  ;;  %1295 = vmatprep.subr.bf16.mxu0 %v1294_v52  ;;  %v823_v52 = vld [vmem:[#allocation8 + $0x98] sm:$0xff] }
 0x48b   : > { %v550_v54 = vsel %vm549_vm5, -inf, %v526_v39  ;;  %v1246_v39 = vpack.c.bf16 %v585_v35, %v583_v34  ;;  %v1264_v34 = vpack.c.bf16 %v600_v33, %v598_v32  ;;  %v605_v35 = vld [vmem:[#allocation10 + $0xd8] sm:$0xff]  ;;  %v818_v33 = vld [vmem:[#allocation8 + $0x70] sm:$0xff] }
 0x48c   : > { %551 = vmax.xlane.f32.xlu1 %v550_v54 }
 0x48d   : > { %1247 = vmatprep.subr.bf16.mxu1 %v1246_v39  ;;  %v604_v39 = vld [vmem:[#allocation10 + $0xd0] sm:$0xff] }
 0x48e   : > { %1249 = vmatpush1.bf16.msra.mxu1 %v1248_v46 }
 0x48f   : > { %1251 = vmatprep.subr.bf16.mxu1 %v1250_v49  ;;  %v804_v49 = vld [vmem:[#allocation8] sm:$0xff] }
 0x519   : > { %v552_v55 = vpop.xlane.xlu1 %551 }
 0x51a   : > { %vm553_vm6 = vcmp.eq.f32.partialorder %v550_v54, %v552_v55  ;;  %v703_v54 = vld [vmem:[#allocation7 + $0xb0] sm:$0xff]  ;;  %v591_v55 = vld [vmem:[#allocation10 + $0x68] sm:$0xff] }
 0x51b   : > { %v554_v56 = vsel %vm553_vm6, %v2004_v28, 128 }
 0x51c   : > { %v556_v57 = vshra.s32 %v554_v56, 16  ;;  %v555_v59 = vand.u32 65535, %v554_v56  ;;  %v593_v56 = vld [vmem:[#allocation10 + $0x78] sm:$0xff] }
 0x51d   : > { %v1254_v63 = vpack.c.bf16 %v593_v56, %v591_v55 }
 0x51e   : > { %v558_v58 = vcvt.s32.f32 %v556_v57  ;;  %v557_v61 = vcvt.s32.f32 %v555_v59  ;;  %v706_v57 = vld [vmem:[#allocation7 + $0xc8] sm:$0xff]  ;;  %v1252_v59 = vpack.c.bf16 %v588_v51, %v586_v50  ;;  %v822_v51 = vld [vmem:[#allocation8 + $0x90] sm:$0xff] }
 0x51f   : > { %v805_v50 = vld [vmem:[#allocation8 + $0x8] sm:$0xff] }
 0x520   : > { %559 = vmin.xlane.f32.xlu0 %v558_v58  ;;  %1253 = vmatpush1.bf16.msra.mxu1 %v1252_v59  ;;  %v1308_v55 = vpack.c.bf16 %v805_v50, %v804_v49  ;;  %v807_v59 = vld [vmem:[#allocation8 + $0x18] sm:$0xff] }
 0x521   : > { %1255 = vmatprep.subr.bf16.mxu1 %v1254_v63 }
 0x524   : > { %1257 = vmatpush1.bf16.msra.mxu1 %v1256_v9  ;;  %v811_v9 = vld [vmem:[#allocation8 + $0x38] sm:$0xff] }
 0x525   : > { %1259 = vmatprep.subr.bf16.mxu1 %v1258_v11  ;;  %v829_v11 = vld [vmem:[#allocation8 + $0xc8] sm:$0xff]  ;;  %v1320_v12 = vpack.c.bf16 %v811_v9, %v810_v8 }
 0x528   : > { %1261 = vmatpush1.bf16.msra.mxu1 %v1260_v17  ;;  %v831_v17 = vld [vmem:[#allocation8 + $0xd8] sm:$0xff] }
 0x529   : > { %1263 = vmatprep.subr.bf16.mxu1 %v1262_v31  ;;  %v835_v31 = vld [vmem:[#allocation8 + $0xf8] sm:$0xff] }
 0x52a   : > { %v1334_v32 = vpack.c.bf16 %v835_v31, %v834_v30 }
 0x52c   : > { %1265 = vmatpush1.bf16.msra.mxu1 %v1264_v34  ;;  %v819_v34 = vld [vmem:[#allocation8 + $0x78] sm:$0xff] }
 0x5ad   : > { %v2024_v60 = vpop.xlane.xlu0 %559 }
 0x5ae   : > { %vm561_vm7 = vcmp.eq.f32.partialorder %v558_v58, %v2024_v60  ;;  %v708_v58 = vld [vmem:[#allocation7 + $0xd8] sm:$0xff]  ;;  %v566_v20 = vcvt.f32.s32 %v2024_v60  ;;  %v603_v60 = vld [vmem:[#allocation10 + $0xc8] sm:$0xff] }
 0x5af   : > { %v562_v62 = vsel %vm561_vm7, %v557_v61, inf  ;;  %v1296_v61 = vpack.c.bf16 %v703_v54, %v701_v48  ;;  %v1298_v3 = vpack.c.bf16 %v708_v58, %v706_v57  ;;  %v1266_v37 = vpack.c.bf16 %v605_v35, %v603_v60  ;;  %v806_v58 = vld [vmem:[#allocation8 + $0x10] sm:$0xff] }
 0x5b0   : > { %563 = vmin.xlane.f32.xlu1 %v562_v62  ;;  %v705_v62 = vld [vmem:[#allocation7 + $0xc0] sm:$0xff]  ;;  %v567_v22 = vshll.u32 %v566_v20, 16  ;;  %v1310_v57 = vpack.c.bf16 %v823_v52, %v822_v51  ;;  %v1312_v63 = vpack.c.bf16 %v807_v59, %v806_v58  ;;  %v814_v20 = vld [vmem:[#allocation8 + $0x50] sm:$0xff]  ;;  %v1336_v60 = vpack.c.bf16 %v819_v34, %v818_v33 }
 0x5b1   : > { %1297 = vmatpush1.bf16.msra.mxu0 %v1296_v61  ;;  %v1300_v10 = vpack.c.bf16 %v707_v4, %v705_v62  ;;  %1267 = vmatprep.subr.bf16.mxu1 %v1266_v37  ;;  %v824_v61 = vld [vmem:[#allocation8 + $0xa0] sm:$0xff]  ;;  %v825_v62 = vld [vmem:[#allocation8 + $0xa8] sm:$0xff]  ;;  %v826_v4 = vld [vmem:[#allocation8 + $0xb0] sm:$0xff] }
 0x5b2   : > { %1299 = vmatprep.subr.bf16.mxu0 %v1298_v3  ;;  %v1314_v0 = vpack.c.bf16 %v825_v62, %v824_v61  ;;  %v809_v3 = vld [vmem:[#allocation8 + $0x28] sm:$0xff]  ;;  %v1318_v7 = vpack.c.bf16 %v827_v5, %v826_v4 }
 0x5b3   : > { %v1316_v6 = vpack.c.bf16 %v809_v3, %v808_v2 }
 0x5b5   : > { %1301 = vmatpush1.bf16.msra.mxu0 %v1300_v10  ;;  %v828_v10 = vld [vmem:[#allocation8 + $0xc0] sm:$0xff] }
 0x5b6   : > { %1303 = vmatprep.subr.bf16.mxu0 %v1302_v14  ;;  %v1322_v13 = vpack.c.bf16 %v829_v11, %v828_v10  ;;  %v812_v14 = vld [vmem:[#allocation8 + $0x40] sm:$0xff] }
 0x5b9   : > { %1305 = vmatpush1.bf16.msra.mxu0 %v1304_v18  ;;  %v1324_v18 = vpack.c.bf16 %v813_v15, %v812_v14 }
 0x5bc   : > { %778 = vmatmul.mubr.f32.vlgmr.msra.gmra.mrb[2].mxu0 %v424_v19  ;;  %v1326_v19 = vpack.c.bf16 %v831_v17, %v830_v16 }
 0x63d   : > { %v564_v21 = vpop.xlane.xlu1 %563 }
 0x63e   : > { %v565_v23 = vcvt.f32.s32 %v564_v21  ;;  %v815_v21 = vld [vmem:[#allocation8 + $0x58] sm:$0xff] }
 0x640   : > { %v568_v24 = vadd.s32 %v567_v22, %v565_v23  ;;  %v832_v22 = vld [vmem:[#allocation8 + $0xe0] sm:$0xff]  ;;  %v833_v23 = vld [vmem:[#allocation8 + $0xe8] sm:$0xff] }
 0x642   : > { %vm569_vm8 = vcmp.eq.s32.totalorder %v2004_v28, %v568_v24  ;;  %v607_v28 = vld [vmem:[#allocation10 + $0xe8] sm:$0xff]  ;;  %v1328_v24 = vpack.c.bf16 %v815_v21, %v814_v20 }
 0x643   : > { %v1124_v25 = vsel %vm569_vm8, 1.0, %v1708_v1  ;;  %v1268_v1 = vpack.c.bf16 %v604_v39, %v602_v36 }
 0x644   : > { %v572_v26 = vadd.f32 %v1124_v25, %v2020_v53  ;;  %v1270_v53 = vpack.c.bf16 %v609_v40, %v607_v28  ;;  %v1330_v25 = vpack.c.bf16 %v833_v23, %v832_v22 }
 0x645   : > { %1269 = vmatpush1.bf16.msra.mxu1 %v1268_v1 }
 0x646   : > { %v573_v27 = vmul.f32 %v572_v26, %v2012_v38  ;;  %v606_v38 = vld [vmem:[#allocation10 + $0xe0] sm:$0xff]  ;;  %1271 = vmatprep.subr.bf16.mxu1 %v1270_v53 }
 0x647   : > { %v1272_v42 = vpack.c.bf16 %v608_v41, %v606_v38  ;;  %v816_v26 = vld [vmem:[#allocation8 + $0x60] sm:$0xff] }
 0x648   : > { %574 = vadd.xlane.f32.xlu0 %v573_v27 }
 0x649   : > { %1273 = vmatpush1.bf16.msra.mxu1 %v1272_v42 }
 0x64a   : > { %1307 = vmatprep.subr.bf16.mxu1 %v1306_v45 }
 0x68f   : > { %v2037_v46 = vpop.f32.mrb[2].mxu0 }
 0x690   : > { %v2039_v47 = vpop.f32.mrb[3].mxu0  ;;  %v784_v35 = vmul.f32 %v2037_v46, %v2037_v46 }
 0x691   : > { %v785_v36 = vmul.f32 %v2039_v47, %v2039_v47 }
 0x692   : > { %v786_v37 = vmul.f32 %v784_v35, %v2037_v46 }
 0x693   : > { %v787_v39 = vmul.f32 %v785_v36, %v2039_v47 }
 0x694   : > { %v788_v28 = vmul.f32 0.044715, %v786_v37 }
 0x695   : > { %v789_v40 = vmul.f32 0.044715, %v787_v39 }
 0x696   : > { %v790_v1 = vadd.f32 %v788_v28, %v2037_v46 }
 0x697   : > { %v791_v53 = vadd.f32 %v789_v40, %v2039_v47 }
 0x698   : > { %v792_v38 = vmul.f32 0.7978846, %v790_v1 }
 0x699   : > { %v793_v41 = vmul.f32 0.7978846, %v791_v53 }
 0x6d5   : > { %v575_v48 = vpop.xlane.xlu0 %574 }
 0x6d6   : > { %1441 = vrcp.f32 %v575_v48 }
 0x6d7   : > { %1443 = vtanh.f32 %v792_v38 }
 0x6d8   : > { %1445 = vtanh.f32 %v793_v41 }
 0x6e0   : > { %v1442_v54 = vpop.eup %1441 }
 0x6e1   : > { %v577_v56 = vmul.f32 %v1442_v54, %v573_v27  ;;  %v817_v27 = vld [vmem:[#allocation8 + $0x68] sm:$0xff]  ;;  %v1444_v42 = vpop.eup %1443 }
 0x6e2   : > { %v1332_v29 = vpack.c.bf16 %v817_v27, %v816_v26  ;;  %v1446_v43 = vpop.eup %1445  ;;  %v796_v44 = vadd.f32 1.0, %v1444_v42 }
 0x6e3   : > { %675 = vmatmul.mubr.f32.vlgmr.msra.gmra.mrb[0].mxu1 %v577_v56  ;;  %v797_v45 = vadd.f32 1.0, %v1446_v43 }
 0x6e4   : > { %1309 = vmatpush3.bf16.msra.mxu1 %v1308_v55  ;;  %v798_v48 = vmul.f32 0.5, %v796_v44 }
 0x6e5   : > { %1311 = vmatprep.subr.bf16.mxu1 %v1310_v57  ;;  %v799_v49 = vmul.f32 0.5, %v797_v45 }
 0x6e6   : > { %v800_v50 = vmul.f32 %v798_v48, %v2037_v46 }
 0x6e7   : > { %v801_v52 = vmul.f32 %v799_v49, %v2039_v47 }
 0x6e8   : > { %1313 = vmatpush3.bf16.msra.mxu1 %v1312_v63 }
 0x6e9   : > { %1315 = vmatprep.subr.bf16.mxu1 %v1314_v0 }
 0x6ec   : > { %1317 = vmatpush3.bf16.msra.mxu1 %v1316_v6 }
 0x6ed   : > { %1319 = vmatprep.subr.bf16.mxu1 %v1318_v7 }
 0x6f0   : > { %1321 = vmatpush3.bf16.msra.mxu1 %v1320_v12 }
 0x6f1   : > { %1323 = vmatprep.subr.bf16.mxu1 %v1322_v13 }
 0x6f4   : > { %1325 = vmatpush3.bf16.msra.mxu1 %v1324_v18 }
 0x6f5   : > { %1327 = vmatprep.subr.bf16.mxu1 %v1326_v19 }
 0x6f8   : > { %1329 = vmatpush3.bf16.msra.mxu1 %v1328_v24 }
 0x6f9   : > { %1331 = vmatprep.subr.bf16.mxu1 %v1330_v25 }
 0x6fc   : > { %1333 = vmatpush3.bf16.msra.mxu1 %v1332_v29 }
 0x6fd   : > { %1335 = vmatprep.subr.bf16.mxu1 %v1334_v32 }
 0x700   : > { %1337 = vmatpush3.bf16.msra.mxu1 %v1336_v60 }
 0x7b6   : > { %v676_v51 = vpop.f32.mrb[0].mxu1 }
 0x7b7   : > { %v802_v54 = vmul.f32 %v800_v50, %v676_v51  ;;  %v678_v55 = vpop.f32.mrb[1].mxu1 }
 0x7b8   : > { %v803_v56 = vmul.f32 %v801_v52, %v678_v55 }
 0x7ba   : > { %901 = vmatprep.mubr.f32.mxu1 %v803_v56 }
 0x7bb   : > { %902 = vmatmul.mubr.f32.vlgmr.msra.gmra.mrb[2].mxu1 %v802_v54 }
 0x7bc   : > { %1602 = shalt.err (!%p1599_p2)
}
 0x7bd   : > { %s1603_s25 = scalar_lea.hbm %s938_s10, 128  ;;  %s1607_s22 = scalar_lea.hbm %s2138_s8, 256 }
 0x7be   : > { %p1604_p8 = scmp.ne.s32.totalorder %s938_s10, %s1603_s25  ;;  %p1608_p11 = scmp.lt.u32.totalorder %s938_s10, %s2138_s8 }
 0x7bf   : > { %p1609_p1 = scmp.lt.u32.totalorder %s1607_s22, %s1603_s25  ;;  %p1611_p5 = scmp.lt.u32.totalorder %s1603_s25, %s938_s10 }
 0x7c0   : > { %p1605_p4 = pnand %p1604_p8, %p2161_p7 }
 0x7c1   : > { %p1610_p6 = por %p1609_p1, %p1608_p11 }
 0x7c2   : > { %p1606_p10 = pneg %p1605_p4 }
 0x7c3   : > { %p1612_p9 = por %p1611_p5, %p1610_p6 }
 0x7c5   : > { %p1613_p12 = pnand %p1612_p9, %p1606_p10 }
 0x7c7   : > { %1616 = shalt.err (!%p1613_p12)
}
 0x7c8   : > { %1357 = dma.vmem_to_hbm [thread:$0]  (%p2161_p7), %s2054_s26, 128, %s938_s10, %s914_s23  }
 0x7c9   : > { %s2162_s18 = scalar_lea.vmem [#allocation2], %s1975_s14  ;;  %s408_s0 = scalar_lea.vmem [#allocation11], %s1975_s14 }
 0x7ca   : > { %v836_v47 = vld [vmem:[%s2162_s18] sm:$0xff]  ;;  %s927_s17 = sshll.u32 %s408_s0, 4  ;;  %s2163_s22 = sshll.u32 %s1777_s11, 7  ;;  %s2088_s17 = int_to_ptr.vmem [resolvable:$true] %s927_s17 }
 0x7cb   : > { %s2086_s20 = scalar_lea.hbm %s2137_s7, %s2163_s22  ;;  %s909_s26 = scalar_lea.sflag [#allocation4], %s1972_s3 }
 0x7cc   : > { %s1617_s10 = scalar_lea.vmem %s2088_s17, 128  ;;  %s1710_s14 = smov [#allocation11]  }
 0x7cd   : > { %p1618_p3 = scmp.ne.s32.totalorder %s2088_s17, %s1617_s10  ;;  %s1621_s23 = sshll.u32 %s1710_s14, 4  ;;  %s1622_s23 = int_to_ptr.vmem [resolvable:$false] %s1621_s23 }
 0x7ce   : > { %s1623_s11 = scalar_lea.vmem %s1622_s23, 256  ;;  %p1624_p2 = scmp.lt.s32.totalorder %s2088_s17, %s1622_s23 }
 0x7cf   : > { %p1619_p13 = pnand %p1618_p3, %p2161_p7  ;;  %p1625_p8 = scmp.lt.s32.totalorder %s1623_s11, %s1617_s10 }
 0x7d1   : > { %p1620_p0 = pneg %p1619_p13  ;;  %p1626_p4 = por %p1625_p8, %p1624_p2 }
 0x7d3   : > { %p1627_p10 = pnand %p1626_p4, %p1620_p0 }
 0x88e   : > { %v1180_v46 = vpop.f32.mrb[2].mxu1 }
 0x88f   : > { %v1181_v57 = vpop.f32.mrb[3].mxu1 }
 0x890   : > { %v1182_v58 = vadd.f32 %v1181_v57, %v1180_v46 }
 0x892   : > { %v904_v59 = vadd.f32 %v1182_v58, %v836_v47 }
 0x894   : > { %907 = vst [vmem:[%s408_s0] sm:$0xff] %v904_v59 }
 0x895   : > { %1630 = shalt.err (!%p1627_p10)
}
 0x896   : > { %s1631_s3 = scalar_lea.hbm %s2086_s20, 128  ;;  %s1635_s9 = scalar_lea.hbm %s2137_s7, 256 }
 0x897   : > { %p1632_p11 = scmp.ne.s32.totalorder %s2086_s20, %s1631_s3  ;;  %p1636_p5 = scmp.lt.u32.totalorder %s2086_s20, %s2137_s7 }
 0x898   : > { %p1637_p9 = scmp.lt.u32.totalorder %s1635_s9, %s1631_s3  ;;  %p1639_p3 = scmp.lt.u32.totalorder %s1631_s3, %s2086_s20 }
 0x899   : > { %p1633_p1 = pnand %p1632_p11, %p2161_p7 }
 0x89a   : > { %p1638_p12 = por %p1637_p9, %p1636_p5 }
 0x89b   : > { %p1634_p6 = pneg %p1633_p1 }
 0x89c   : > { %p1640_p13 = por %p1639_p3, %p1638_p12 }
 0x89e   : > { %p1641_p0 = pnand %p1640_p13, %p1634_p6 }
 0x8a0   : > { %1644 = shalt.err (!%p1641_p0)
}
 0x8a1   : > { %1356 = dma.vmem_to_hbm [thread:$0]  (%p2161_p7), %s2088_s17, 128, %s2086_s20, %s909_s26  }
 0x8a2 PF: > { %s952_s22 = sand.u32 1, %s1683_s27   ;;  %p2164_p2 = scmp.ne.s32.totalorder %s2153_s24, 0 }
 0x8a3   : > { %p2165_p8 = scmp.ge.s32.totalorder %s1695_s30, 2  ;;  %s953_s13 = scalar_lea.sflag [#allocation4], %s952_s22 }
 0x8a5   : > { %p1378_p4 = pnand %p2165_p8, %p2164_p2 }
 0x8a7   : > { %1674 = dma.done.wait (!%p1378_p4), %s953_s13, 128  }
 0x8a8   : > { %1676 = vsyncadd (!%p1378_p4), %s953_s13, 4294967168  ;;  %s962_s16 = scalar_lea.sflag [#allocation13], %s952_s22 }
 0x8a9   : > { %1678 = dma.done.wait (!%p1378_p4), %s962_s16, 128  }
 0x8aa   : > { %1680 = vsyncadd (!%p1378_p4), %s962_s16, 4294967168  ;;  %p27_p7 = scmp.ge.s32.totalorder %s1896_s15, 4   ;;  %s2166_s27 = smov %s1687_s28 }
 0x8ab   : > { %s2167_s28 = smov %s1691_s29  ;;  %s2168_s29 = smov %s1907_s21 }
 0x8ac   : > { %s2169_s30 = smov %s1896_s15  ;;  %29 = sbr.rel (!%p27_p7) target bundleno = 12 (0xc), region = 132 }
 0x8b3   :  { %967 = vsyncpa [#allocation3], 1 }
 0x8b4   :  { %969 = vsyncpa [#allocation3 + $0x1], 1 }
 0x8b5   :  { %970 = vsyncpa [#allocation6], 1 }
 0x8b6   :  { %971 = vsyncpa [#allocation9], 1 }
 0x8b7   :  { %972 = vsyncpa [#allocation4], 1 }
 0x8b8   :  { %974 = vsyncpa [#allocation4 + $0x1], 1 }
 0x8b9   :  { %975 = vsyncpa [#allocation13], 1 }
 0x8ba   :  { %977 = vsyncpa [#allocation13 + $0x1], 1 }

// kernel: tpu_custom_call.1
= control target key start
LH: loop header
LB: loop body
LE: loop exit
PB: predicated region body
PF: predicated region fallthrough
CT: control target
= control target key end

     0   :  { %s2130_s0 = inlined_call_operand.vmem [shape: f32[16,128], index: 0, kind: input, shape index: {}]   ;;  %s2131_s1 = inlined_call_operand.hbm [shape: f32[16,128], index: 1, kind: input, shape index: {}, may-alias: {1,7}]   ;;  %s2132_s2 = inlined_call_operand.vmem [shape: f32[16,128], index: 2, kind: input, shape index: {}]   ;;  %s2133_s3 = inlined_call_operand.hbm [shape: f32[128,128], index: 3, kind: input, shape index: {}]   ;;  %s2134_s4 = inlined_call_operand.hbm [shape: f32[128,256], index: 4, kind: input, shape index: {}]   ;;  %s2135_s5 = inlined_call_operand.hbm [shape: f32[256,128], index: 5, kind: input, shape index: {}]   ;;  %s2136_s6 = inlined_call_operand.hbm [shape: f32[128,256], index: 6, kind: input, shape index: {}]   ;;  %s2137_s7 = inlined_call_operand.hbm [shape: f32[16,128], index: 7, kind: output, shape index: {0}, may-alias: {1,7}]   ;;  %s2138_s8 = inlined_call_operand.hbm [shape: f32[16,128], index: 8, kind: output, shape index: {1}]  }
   0x1   :  { %2143 = sst [smem:[#allocation19_spill]] %s2130_s0 }
   0x2   :  { %2144 = sst [smem:[#allocation20_spill]] %s2133_s3 }
   0x3   :  { %14 = vsyncpa [#allocation3], 0 }
   0x4   :  { %16 = vsyncpa [#allocation3 + $0x1], 0 }
   0x5   :  { %17 = vsyncpa [#allocation6], 0 }
   0x6   :  { %18 = vsyncpa [#allocation9], 0 }
   0x7   :  { %19 = vsyncpa [#allocation4], 0 }
   0x8   :  { %21 = vsyncpa [#allocation4 + $0x1], 0 }
   0x9   :  { %22 = vsyncpa [#allocation13], 0 }
   0xa   :  { %24 = vsyncpa [#allocation13 + $0x1], 0  ;;  %s1756_s27 = smov 0   ;;  %s1758_s28 = smov 0  }
   0xb   :  { %s1760_s29 = smov 0   ;;  %s1762_s30 = smov 0  }
   0xc LB: > { %s1697_s9 = smov [#allocation5]   ;;  %s1777_s11 = sadd.s32 4294967295, %s1695_s30   ;;  %s1695_s30 = sphi %s1762_s30, %s2169_s30   ;;  %s1691_s29 = sphi %s1760_s29, %s2168_s29   ;;  %s1687_s28 = sphi %s1758_s28, %s2167_s28   ;;  %s1683_s27 = sphi %s1756_s27, %s2166_s27  }
   0xd   : > { %s261_s10 = sshll.u32 %s1697_s9, 4  ;;  %p1105_p0 = scmp.ge.s32.totalorder %s1695_s30, 1  ;;  %s1782_s10 = int_to_ptr.vmem [resolvable:$true] %s261_s10 }
   0xe   : > { %p2139_p1 = scmp.eq.s32.totalorder %s1777_s11, 0  ;;  %p249_p2 = scmp.lt.s32.totalorder %s1695_s30, 3 }
   0xf   : > { %s1698_s13 = smov [#allocation8]   ;;  %s1699_s16 = smov [#allocation7]  }
  0x10   : > { %p1784_p3 = pnand %p1105_p0, %p249_p2  ;;  %s287_s14 = sshll.u32 %s1698_s13, 4  ;;  %s1797_s14 = int_to_ptr.vmem [resolvable:$true] %s287_s14 }
  0x11   : > { %s274_s17 = sshll.u32 %s1699_s16, 4  ;;  %s2147_s3 = sld [smem:[#allocation20_spill]]  ;;  %s1799_s17 = int_to_ptr.vmem [resolvable:$true] %s274_s17 }
  0x12   : > { %s2145_s12 = scalar_select %p1784_p3, 1, 0 }
  0x13   : > { %p1360_p5 = pneg %p1784_p3 }
  0x15   : > { %p1793_p6 = pnand %p1360_p5, %p2139_p1 }
  0x17   : > { %s1447_s20 = scalar_lea.hbm %s2147_s3, 2048  ;;  %p1809_p8 = pneg %p1793_p6 }
  0x18   : > { %p1448_p7 = scmp.ne.s32.totalorder %s2147_s3, %s1447_s20  ;;  %p1454_p11 = scmp.lt.u32.totalorder %s1447_s20, %s2147_s3 }
  0x1a   : > { %p1450_p9 = pnand %p1809_p8, %p1448_p7 }
  0x1c   : > { %p1451_p10 = pneg %p1450_p9 }
  0x1e   : > { %p1456_p12 = pnand %p1454_p11, %p1451_p10 }
  0x20   : > { %1459 = shalt.err (!%p1456_p12)
}
  0x21   : > { %s1460_s26 = scalar_lea.vmem %s1782_s10, 2048  ;;  %p1468_p5 = scmp.lt.s32.totalorder %s1782_s10, %s1782_s10 }
  0x22   : > { %p1461_p13 = scmp.ne.s32.totalorder %s1782_s10, %s1460_s26  ;;  %p1469_p4 = scmp.lt.s32.totalorder %s1460_s26, %s1460_s26 }
  0x24   : > { %p1463_p0 = pnand %p1461_p13, %p1809_p8  ;;  %p1470_p7 = por %p1469_p4, %p1468_p5 }
  0x26   : > { %p1464_p2 = pneg %p1463_p0 }
  0x28   : > { %p1471_p9 = pnand %p1470_p7, %p1464_p2 }
  0x2a   : > { %1474 = shalt.err (!%p1471_p9)
}
  0x2b   : > { %s1700_s9 = smov 128   ;;  %s1701_s13 = smov 8  }
  0x2c   : > { %1363 = dma.hbm_to_vmem [thread:$0]  (!%p1793_p6), %s2147_s3, 2048, %s1782_s10, [#allocation6], %s1700_s9, %s1700_s9, %s1701_s13  }
  0x2d   : > { %s1475_s21 = scalar_lea.hbm %s2135_s5, 4096 }
  0x2e   : > { %p1476_p4 = scmp.ne.s32.totalorder %s2135_s5, %s1475_s21  ;;  %p1482_p12 = scmp.lt.u32.totalorder %s1475_s21, %s2135_s5 }
  0x30   : > { %p1478_p10 = pnand %p1476_p4, %p1809_p8 }
  0x32   : > { %p1479_p11 = pneg %p1478_p10 }
  0x34   : > { %p1484_p13 = pnand %p1482_p12, %p1479_p11 }
  0x36   : > { %1487 = shalt.err (!%p1484_p13)
}
  0x37   : > { %s1488_s10 = scalar_lea.vmem %s1797_s14, 4096  ;;  %p1496_p7 = scmp.lt.s32.totalorder %s1797_s14, %s1797_s14 }
  0x38   : > { %p1489_p0 = scmp.ne.s32.totalorder %s1797_s14, %s1488_s10  ;;  %p1497_p9 = scmp.lt.s32.totalorder %s1488_s10, %s1488_s10 }
  0x3a   : > { %p1491_p2 = pnand %p1489_p0, %p1809_p8  ;;  %p1498_p4 = por %p1497_p9, %p1496_p7 }
  0x3c   : > { %p1492_p5 = pneg %p1491_p2 }
  0x3e   : > { %p1499_p10 = pnand %p1498_p4, %p1492_p5 }
  0x40   : > { %1502 = shalt.err (!%p1499_p10)
}
  0x41   : > { %1369 = dma.hbm_to_vmem [thread:$0]  (!%p1793_p6), %s2135_s5, 4096, %s1797_s14, [#allocation9], %s1700_s9, %s1700_s9, %s1701_s13  }
  0x42   : > { %s1503_s21 = scalar_lea.hbm %s2134_s4, 4096 }
  0x43   : > { %p1504_p11 = scmp.ne.s32.totalorder %s2134_s4, %s1503_s21  ;;  %p1510_p0 = scmp.lt.u32.totalorder %s1503_s21, %s2134_s4 }
  0x45   : > { %p1506_p12 = pnand %p1504_p11, %p1809_p8 }
  0x47   : > { %p1507_p13 = pneg %p1506_p12 }
  0x49   : > { %p1512_p2 = pnand %p1510_p0, %p1507_p13 }
  0x4b   : > { %1515 = shalt.err (!%p1512_p2)
}
  0x4c   : > { %s1516_s14 = scalar_lea.vmem %s1799_s17, 4096  ;;  %p1524_p4 = scmp.lt.s32.totalorder %s1799_s17, %s1799_s17 }
  0x4d   : > { %p1517_p5 = scmp.ne.s32.totalorder %s1799_s17, %s1516_s14  ;;  %p1525_p10 = scmp.lt.s32.totalorder %s1516_s14, %s1516_s14 }
  0x4f   : > { %p1519_p7 = pnand %p1517_p5, %p1809_p8  ;;  %p1526_p11 = por %p1525_p10, %p1524_p4 }
  0x51   : > { %p1520_p9 = pneg %p1519_p7 }
  0x53   : > { %p1527_p12 = pnand %p1526_p11, %p1520_p9 }
  0x55   : > { %1530 = shalt.err (!%p1527_p12)
}
  0x56   : > { %s1702_s9 = smov 256   ;;  %s1703_s13 = smov 16  }
  0x57   : > { %1366 = dma.hbm_to_vmem [thread:$0]  (!%p1793_p6), %s2134_s4, 4096, %s1799_s17, [#allocation6], %s1702_s9, %s1702_s9, %s1703_s13  }
  0x58   : > { %s1704_s18 = smov [#allocation10]   ;;  %s1531_s22 = scalar_lea.hbm %s2136_s6, 4096 }
  0x59   : > { %s300_s19 = sshll.u32 %s1704_s18, 4  ;;  %p1532_p13 = scmp.ne.s32.totalorder %s2136_s6, %s1531_s22  ;;  %s301_s19 = int_to_ptr.vmem [resolvable:$true] %s300_s19 }
  0x5a   : > { %p1538_p5 = scmp.lt.u32.totalorder %s1531_s22, %s2136_s6 }
  0x5b   : > { %p1534_p0 = pnand %p1532_p13, %p1809_p8 }
  0x5d   : > { %p1535_p2 = pneg %p1534_p0 }
  0x5f   : > { %p1540_p7 = pnand %p1538_p5, %p1535_p2 }
  0x61   : > { %1543 = shalt.err (!%p1540_p7)
}
  0x62   : > { %s1544_s17 = scalar_lea.vmem %s301_s19, 4096  ;;  %p1552_p11 = scmp.lt.s32.totalorder %s301_s19, %s301_s19 }
  0x63   : > { %p1545_p9 = scmp.ne.s32.totalorder %s301_s19, %s1544_s17  ;;  %p1553_p12 = scmp.lt.s32.totalorder %s1544_s17, %s1544_s17 }
  0x65   : > { %p1547_p4 = pnand %p1545_p9, %p1809_p8  ;;  %p1554_p1 = por %p1553_p12, %p1552_p11 }
  0x67   : > { %p1548_p10 = pneg %p1547_p4 }
  0x69   : > { %p1555_p3 = pnand %p1554_p1, %p1548_p10 }
  0x6b   : > { %1558 = shalt.err (!%p1555_p3)
}
  0x6c   : > { %1372 = dma.hbm_to_vmem [thread:$0]  (!%p1793_p6), %s2136_s6, 4096, %s301_s19, [#allocation9], %s1702_s9, %s1702_s9, %s1703_s13  }
  0x6d   : > { %s1104_s23 = sadd.s32 4294967294, %s1695_s30   ;;  %s1896_s15 = sadd.s32 1, %s1695_s30  }
  0x6e   : > { %s60_s18 = ssub.s32 %s1695_s30, %s1896_s15  ;;  %s63_s20 = sadd.s32 1, %s1691_s29 }
  0x6f   : > { %p61_p1 = scmp.eq.s32.totalorder %s60_s18, 0  ;;  %p70_p3 = scmp.ne.s32.totalorder %s1691_s29, %s1687_s28 }
  0x70   : > { %p71_p8 = scmp.eq.s32.totalorder %s1695_s30, 0  ;;  %p76_p13 = scmp.ne.s32.totalorder %s1687_s28, %s1683_s27 }
  0x71   : > { %s1907_s21 = scalar_select %p61_p1, %s1691_s29, %s63_s20  }
  0x72   : > { %p1909_p0 = por %p71_p8, %p70_p3  ;;  %p2150_p2 = scmp.eq.s32.totalorder %s1777_s11, 0 }
  0x73   : > { %p210_p5 = scmp.eq.s32.totalorder %s1777_s11, 1  ;;  %p216_p7 = scmp.eq.s32.totalorder %s1104_s23, 1 }
  0x74   : > { %p1915_p6 = por %p2150_p2, %p76_p13  ;;  %p1388_p9 = scmp.lt.s32.totalorder %s1695_s30, 2 }
  0x75   : > { %s321_s13 = sand.u32 1, %s1691_s29   ;;  %p1922_p4 = por %p210_p5, %p70_p3 }
  0x76   : > { %p1926_p10 = por %p216_p7, %p76_p13  ;;  %s1111_s25 = sshll.u32 %s321_s13, 3 }
  0x77   : > { %s2152_s19 = scalar_select %p1922_p4, 1, 0 }
  0x78   : > { %s2153_s24 = scalar_select %p1926_p10, 1, 0 }
  0x79   : > { %s1112_s26 = sshll.u32 %s1695_s30, 7  ;;  %s325_s16 = scalar_lea.vmem [#allocation2], %s1111_s25 }
  0x7a   : > { %s1934_s10 = scalar_lea.hbm %s2131_s1, %s1112_s26  ;;  %s332_s23 = sshll.u32 %s325_s16, 4  ;;  %s1936_s23 = int_to_ptr.vmem [resolvable:$true] %s332_s23 }
  0x7b   : > { %p1940_p11 = pnand %p1388_p9, %p1909_p0  ;;  %s322_s20 = scalar_lea.sflag [#allocation3], %s321_s13 }
  0x7c   : > { %s1559_s3 = scalar_lea.hbm %s1934_s10, 128  ;;  %s1564_s14 = scalar_lea.hbm %s2131_s1, 256 }
  0x7d   : > { %p1560_p12 = scmp.ne.s32.totalorder %s1934_s10, %s1559_s3  ;;  %p1561_p1 = pneg %p1940_p11 }
  0x7e   : > { %p1565_p13 = scmp.lt.u32.totalorder %s1934_s10, %s2131_s1  ;;  %p1566_p0 = scmp.lt.u32.totalorder %s1564_s14, %s1559_s3 }
  0x7f   : > { %p1562_p3 = pnand %p1561_p1, %p1560_p12  ;;  %p1568_p5 = scmp.lt.u32.totalorder %s1559_s3, %s1934_s10 }
  0x80   : > { %p1567_p2 = por %p1566_p0, %p1565_p13 }
  0x81   : > { %p1563_p8 = pneg %p1562_p3 }
  0x82   : > { %p1569_p7 = por %p1568_p5, %p1567_p2 }
  0x84   : > { %p1570_p9 = pnand %p1569_p7, %p1563_p8 }
  0x86   : > { %1573 = shalt.err (!%p1570_p9)
}
  0x87   : > { %s1574_s13 = scalar_lea.vmem %s1936_s23, 128  ;;  %s1705_s16 = smov [#allocation2]  }
  0x88   : > { %p1575_p12 = scmp.ne.s32.totalorder %s1936_s23, %s1574_s13  ;;  %s1579_s25 = sshll.u32 %s1705_s16, 4  ;;  %s1580_s25 = int_to_ptr.vmem [resolvable:$false] %s1579_s25 }
  0x89   : > { %s1581_s26 = scalar_lea.vmem %s1580_s25, 256  ;;  %p1582_p4 = scmp.lt.s32.totalorder %s1936_s23, %s1580_s25 }
  0x8a   : > { %p1577_p3 = pnand %p1575_p12, %p1561_p1  ;;  %p1583_p13 = scmp.lt.s32.totalorder %s1581_s26, %s1574_s13 }
  0x8c   : > { %p1578_p10 = pneg %p1577_p3  ;;  %p1584_p0 = por %p1583_p13, %p1582_p4 }
  0x8e   : > { %p1585_p2 = pnand %p1584_p0, %p1578_p10 }
  0x90   : > { %1588 = shalt.err (!%p1585_p2)
}
  0x91   : > { %1376 = dma.hbm_to_vmem [thread:$0]  (!%p1940_p11), %s1934_s10, 128, %s1936_s23, %s322_s20  }
  0x92   : > { %p2155_p8 = scmp.ne.s32.totalorder %s2145_s12, 0 }
  0x93   : > { %s1972_s3 = sand.u32 (!%p2155_p8), 1, %s1687_s28  }
  0x94   : > { %348 = sbr.rel (%p2155_p8) target bundleno = 2210 (0x8a2), region = 48  ;;  %s1975_s14 = sshll.u32 (!%p2155_p8), %s1972_s3, 3 }
  0x95   : > { %s351_s22 = scalar_lea.sflag (!%p2155_p8), [#allocation3], %s1972_s3 }
  0x9b   : > { %1662 = dma.done.wait (%p1915_p6), %s351_s22, 128  }
  0x9c   : > { %1664 = vsyncadd (%p1915_p6), %s351_s22, 4294967168  ;;  %p2156_p4 = scmp.eq.s32.totalorder %s1777_s11, 0 }
  0x9e   : > { %1666 = dma.done.wait (%p2156_p4), [#allocation6], 6144   ;;  %p2157_p10 = pmov %p2156_p4 }
  0x9f   : > { %p2158_p11 = pmov %p2156_p4 }
  0xa0   : > { %1668 = vsyncadd (%p2157_p10), [#allocation6], 4294961152 }
  0xa1   : > { %1670 = dma.done.wait (%p2158_p11), [#allocation9], 8192   ;;  %p2159_p1 = pmov %p2156_p4 }
  0xa2   : > { %v1706_v0 = vmov 0.0|0.0   ;;  %vm1707_vm0 = vmmov 0   ;;  %v1708_v1 = vmov 0.0   ;;  %v426_v2 = vld [vmem:[#allocation5] sm:$0xff]  ;;  %v427_v3 = vld [vmem:[#allocation5 + $0x8] sm:$0xff]  ;;  %v428_v4 = vld [vmem:[#allocation5 + $0x10] sm:$0xff]  ;;  %v513_v27 = vlaneseq }
  0xa3   : > { %1672 = vsyncadd (%p2159_p1), [#allocation9], 4294959104  ;;  %1218 = vmatprep.subr.bf16.mxu0 %v1706_v0  ;;  %1215 = vmatprep.mubr.msk.f32.mxu0 %vm1707_vm0, %v1708_v1  ;;  %v1219_v5 = vpack.c.bf16 %v427_v3, %v426_v2  ;;  %v429_v6 = vld [vmem:[#allocation5 + $0x18] sm:$0xff]  ;;  %v430_v8 = vld [vmem:[#allocation5 + $0x20] sm:$0xff]  ;;  %p416_p6 = scmp.lt.s32.totalorder %s1777_s11, 1  ;;  %s415_s20 = scalar_lea.vmem [#allocation12], %s1975_s14 }
  0xa4   : > { %674 = vmatprep.mubr.f32.mxu1 %v1708_v1  ;;  %v1222_v7 = vpack.c.bf16 %v429_v6, %v428_v4  ;;  %v431_v9 = vld [vmem:[#allocation5 + $0x28] sm:$0xff]  ;;  %v432_v11 = vld [vmem:[#allocation5 + $0x30] sm:$0xff]  ;;  %v433_v12 = vld [vmem:[#allocation5 + $0x38] sm:$0xff]  ;;  %v2004_v28 = vand.u32 127, %v513_v27  ;;  %s2160_s0 = sld [smem:[#allocation19_spill]]  ;;  %s940_s26 = sshll.u32 %s415_s20, 4  ;;  %s2054_s26 = int_to_ptr.vmem [resolvable:$true] %s940_s26 }
  0xa5   : > { %1220 = vmatpush3.bf16.msra.mxu0 %v1219_v5  ;;  %v1225_v10 = vpack.c.bf16 %v431_v9, %v430_v8  ;;  %v1228_v13 = vpack.c.bf16 %v433_v12, %v432_v11  ;;  %v434_v14 = vld [vmem:[#allocation5 + $0x40] sm:$0xff]  ;;  %v435_v15 = vld [vmem:[#allocation5 + $0x48] sm:$0xff]  ;;  %v436_v17 = vld [vmem:[#allocation5 + $0x50] sm:$0xff]  ;;  %s1995_s12 = scalar_select %p416_p6, %s1777_s11, 1 }
  0xa6   : > { %1221 = vmatprep.subr.bf16.mxu0 %v1706_v0  ;;  %v1231_v16 = vpack.c.bf16 %v435_v15, %v434_v14  ;;  %v437_v18 = vld [vmem:[#allocation5 + $0x58] sm:$0xff]  ;;  %v438_v20 = vld [vmem:[#allocation5 + $0x60] sm:$0xff]  ;;  %v439_v21 = vld [vmem:[#allocation5 + $0x68] sm:$0xff]  ;;  %vm515_vm1 = vcmp.lt.s32.totalorder %v2004_v28, 8  ;;  %s2142_s22 = sshll.u32 %s1777_s11, 7  ;;  %s914_s23 = scalar_lea.sflag [#allocation13], %s1972_s3 }
  0xa7   : > { %v1234_v19 = vpack.c.bf16 %v437_v18, %v436_v17  ;;  %v1237_v22 = vpack.c.bf16 %v439_v21, %v438_v20  ;;  %v440_v23 = vld [vmem:[#allocation5 + $0x70] sm:$0xff]  ;;  %v441_v24 = vld [vmem:[#allocation5 + $0x78] sm:$0xff]  ;;  %s1121_s9 = sshll.u32 %s1995_s12, 3  ;;  %v682_v63 = vld [vmem:[#allocation7 + $0x8] sm:$0xff]  ;;  %s938_s10 = scalar_lea.hbm %s2138_s8, %s2142_s22 }
  0xa8   : > { %v1240_v25 = vpack.c.bf16 %v441_v24, %v440_v23  ;;  %s423_s18 = scalar_lea.vmem %s2132_s2, %s1121_s9  ;;  %v681_v2 = vld [vmem:[#allocation7] sm:$0xff]  ;;  %v683_v4 = vld [vmem:[#allocation7 + $0x10] sm:$0xff]  ;;  %v686_v5 = vld [vmem:[#allocation7 + $0x28] sm:$0xff]  ;;  %p2161_p7 = scmp.ne.s32.totalorder %s2152_s19, 0 }
  0xa9   : > { %1223 = vmatpush3.bf16.msra.mxu0 %v1222_v7  ;;  %v425_v26 = vld [vmem:[%s423_s18] sm:$0xff]  ;;  %v688_v6 = vld [vmem:[#allocation7 + $0x38] sm:$0xff]  ;;  %v1276_v7 = vpack.c.bf16 %v683_v4, %v681_v2  ;;  %v685_v9 = vld [vmem:[#allocation7 + $0x20] sm:$0xff]  ;;  %s1589_s18 = scalar_lea.vmem %s2054_s26, 128  ;;  %s1709_s13 = smov [#allocation12]  }
  0xaa   : > { %1224 = vmatprep.subr.bf16.mxu0 %v1706_v0  ;;  %v1278_v8 = vpack.c.bf16 %v688_v6, %v686_v5  ;;  %v690_v11 = vld [vmem:[#allocation7 + $0x48] sm:$0xff]  ;;  %v692_v12 = vld [vmem:[#allocation7 + $0x58] sm:$0xff]  ;;  %v689_v15 = vld [vmem:[#allocation7 + $0x40] sm:$0xff]  ;;  %s419_s25 = scalar_lea.vmem %s2160_s0, %s1121_s9  ;;  %p1590_p5 = scmp.ne.s32.totalorder %s2054_s26, %s1589_s18 }
  0xab   : > { %v1282_v14 = vpack.c.bf16 %v692_v12, %v690_v11  ;;  %v694_v17 = vld [vmem:[#allocation7 + $0x68] sm:$0xff]  ;;  %v696_v18 = vld [vmem:[#allocation7 + $0x78] sm:$0xff]  ;;  %v693_v21 = vld [vmem:[#allocation7 + $0x60] sm:$0xff]  ;;  %s1593_s16 = sshll.u32 %s1709_s13, 4  ;;  %s1594_s16 = int_to_ptr.vmem [resolvable:$false] %s1593_s16 }
  0xac   : > { %v1286_v20 = vpack.c.bf16 %v696_v18, %v694_v17  ;;  %v698_v23 = vld [vmem:[#allocation7 + $0x88] sm:$0xff]  ;;  %v700_v24 = vld [vmem:[#allocation7 + $0x98] sm:$0xff]  ;;  %v592_v2 = vld [vmem:[#allocation10 + $0x70] sm:$0xff]  ;;  %p1591_p9 = pnand %p1590_p5, %p2161_p7  ;;  %p1596_p3 = scmp.lt.s32.totalorder %s2054_s26, %s1594_s16 }
  0xad   : > { %1226 = vmatpush3.bf16.msra.mxu0 %v1225_v10  ;;  %v687_v10 = vld [vmem:[#allocation7 + $0x30] sm:$0xff]  ;;  %v579_v27 = vld [vmem:[#allocation10 + $0x8] sm:$0xff]  ;;  %v597_v6 = vld [vmem:[#allocation10 + $0x98] sm:$0xff] }
  0xae   : > { %1227 = vmatprep.subr.bf16.mxu0 %v1706_v0  ;;  %v707_v4 = vld [vmem:[#allocation7 + $0xd0] sm:$0xff]  ;;  %v595_v5 = vld [vmem:[#allocation10 + $0x88] sm:$0xff]  ;;  %v594_v12 = vld [vmem:[#allocation10 + $0x80] sm:$0xff]  ;;  %p1592_p12 = pneg %p1591_p9 }
  0xaf   : > { %v1258_v11 = vpack.c.bf16 %v597_v6, %v595_v5  ;;  %v827_v5 = vld [vmem:[#allocation8 + $0xb8] sm:$0xff] }
  0xb1   : > { %1229 = vmatpush3.bf16.msra.mxu0 %v1228_v13  ;;  %v1280_v13 = vpack.c.bf16 %v687_v10, %v685_v9 }
  0xb2   : > { %1230 = vmatprep.subr.bf16.mxu0 %v1706_v0 }
  0xb5   : > { %1232 = vmatpush3.bf16.msra.mxu0 %v1231_v16  ;;  %v691_v16 = vld [vmem:[#allocation7 + $0x50] sm:$0xff] }
  0xb6   : > { %1233 = vmatprep.subr.bf16.mxu0 %v1706_v0 }
  0xb9   : > { %1235 = vmatpush3.bf16.msra.mxu0 %v1234_v19  ;;  %v1284_v19 = vpack.c.bf16 %v691_v16, %v689_v15  ;;  %v709_v15 = vld [vmem:[#allocation7 + $0xe0] sm:$0xff]  ;;  %v711_v16 = vld [vmem:[#allocation7 + $0xf0] sm:$0xff] }
  0xba   : > { %1236 = vmatprep.subr.bf16.mxu0 %v1706_v0  ;;  %v1304_v18 = vpack.c.bf16 %v711_v16, %v709_v15  ;;  %v813_v15 = vld [vmem:[#allocation8 + $0x48] sm:$0xff]  ;;  %v830_v16 = vld [vmem:[#allocation8 + $0xd0] sm:$0xff] }
  0xbd   : > { %1238 = vmatpush3.bf16.msra.mxu0 %v1237_v22  ;;  %v695_v22 = vld [vmem:[#allocation7 + $0x70] sm:$0xff] }
  0xbe   : > { %1239 = vmatprep.subr.bf16.mxu0 %v1706_v0  ;;  %v684_v0 = vld [vmem:[#allocation7 + $0x18] sm:$0xff] }
  0xbf   : > { %v1274_v3 = vpack.c.bf16 %v684_v0, %v682_v63  ;;  %v590_v0 = vld [vmem:[#allocation10 + $0x60] sm:$0xff] }
  0xc0   : > { %v1256_v9 = vpack.c.bf16 %v592_v2, %v590_v0  ;;  %v808_v2 = vld [vmem:[#allocation8 + $0x20] sm:$0xff] }
  0xc1   : > { %1241 = vmatpush3.bf16.msra.mxu0 %v1240_v25  ;;  %v697_v25 = vld [vmem:[#allocation7 + $0x80] sm:$0xff] }
  0xc2   : > { %1275 = vmatprep.subr.bf16.mxu0 %v1274_v3 }
  0xc4   : > { %1216 = vmatmul.mubr.f32.vlgmr.msra.gmra.mrb[0].mxu0 %v425_v26  ;;  %v699_v26 = vld [vmem:[#allocation7 + $0x90] sm:$0xff] }
  0xc5   : > { %777 = vmatprep.mubr.f32.mxu0 %v1708_v1  ;;  %1277 = vmatpush1.bf16.msra.mxu0 %v1276_v7  ;;  %v710_v7 = vld [vmem:[#allocation7 + $0xe8] sm:$0xff] }
  0xc6   : > { %1279 = vmatprep.subr.bf16.mxu0 %v1278_v8  ;;  %v712_v8 = vld [vmem:[#allocation7 + $0xf8] sm:$0xff] }
  0xc9   : > { %1281 = vmatpush1.bf16.msra.mxu0 %v1280_v13  ;;  %v596_v13 = vld [vmem:[#allocation10 + $0x90] sm:$0xff] }
  0xca   : > { %1283 = vmatprep.subr.bf16.mxu0 %v1282_v14  ;;  %v1302_v14 = vpack.c.bf16 %v712_v8, %v710_v7  ;;  %v1260_v17 = vpack.c.bf16 %v596_v13, %v594_v12  ;;  %v810_v8 = vld [vmem:[#allocation8 + $0x30] sm:$0xff] }
  0xcd   : > { %1285 = vmatpush1.bf16.msra.mxu0 %v1284_v19  ;;  %v424_v19 = vld [vmem:[%s419_s25] sm:$0xff] }
  0xce   : > { %1287 = vmatprep.subr.bf16.mxu0 %v1286_v20 }
 0x197   : > { %v508_v29 = vpop.f32.mrb[0].mxu0 }
 0x198   : > { %512 = vst [vmem:[%s415_s20] sm:$0xff] %v508_v29  ;;  %v1217_v30 = vpop.f32.mrb[1].mxu0  ;;  %v516_v31 = vsel %vm515_vm1, %v508_v29, -inf  ;;  %v581_v29 = vld [vmem:[#allocation10 + $0x18] sm:$0xff]  ;;  %s1595_s20 = scalar_lea.vmem %s1594_s16, 256 }
 0x199   : > { %517 = vmax.xlane.f32.xlu0 %v516_v31  ;;  %v578_v30 = vld [vmem:[#allocation10] sm:$0xff]  ;;  %p1597_p13 = scmp.lt.s32.totalorder %s1595_s20, %s1589_s18 }
 0x19b   : > { %p1598_p0 = por %p1597_p13, %p1596_p3 }
 0x19d   : > { %p1599_p2 = pnand %p1598_p0, %p1592_p12 }
 0x226   : > { %v518_v32 = vpop.xlane.xlu0 %517 }
 0x227   : > { %v519_v33 = vsub.f32 %v516_v31, %v518_v32  ;;  %v1288_v31 = vpack.c.bf16 %v695_v22, %v693_v21  ;;  %v1242_v32 = vpack.c.bf16 %v581_v29, %v579_v27  ;;  %v599_v29 = vld [vmem:[#allocation10 + $0xa8] sm:$0xff] }
 0x229   : > { %v520_v34 = vmul.f32 1.442695, %v519_v33  ;;  %v580_v33 = vld [vmem:[#allocation10 + $0x10] sm:$0xff]  ;;  %1243 = vmatprep.subr.bf16.mxu1 %v1242_v32  ;;  %1289 = vmatpush1.bf16.msra.mxu0 %v1288_v31  ;;  %v598_v32 = vld [vmem:[#allocation10 + $0xa0] sm:$0xff] }
 0x22b   : > { %1437 = vpow2.f32 %v520_v34  ;;  %v583_v34 = vld [vmem:[#allocation10 + $0x28] sm:$0xff] }
 0x235   : > { %v1438_v35 = vpop.eup %1437 }
 0x236   : > { %522 = vadd.xlane.f32.xlu0 %v1438_v35 }
 0x2c3   : > { %v523_v36 = vpop.xlane.xlu0 %522 }
 0x2c4   : > { %1439 = vrcp.f32 %v523_v36  ;;  %v1290_v36 = vpack.c.bf16 %v700_v24, %v698_v23 }
 0x2c6   : > { %1291 = vmatprep.subr.bf16.mxu0 %v1290_v36  ;;  %v602_v36 = vld [vmem:[#allocation10 + $0xc0] sm:$0xff] }
 0x2ce   : > { %v1440_v37 = vpop.eup %1439 }
 0x2cf   : > { %v2012_v38 = vmul.f32 %v1440_v37, %v1438_v35  ;;  %v585_v35 = vld [vmem:[#allocation10 + $0x38] sm:$0xff]  ;;  %v1244_v37 = vpack.c.bf16 %v580_v33, %v578_v30  ;;  %v600_v33 = vld [vmem:[#allocation10 + $0xb0] sm:$0xff] }
 0x2d0   : > { %v601_v30 = vld [vmem:[#allocation10 + $0xb8] sm:$0xff] }
 0x2d1   : > { %v526_v39 = vsel %vm515_vm1, %v2012_v38, -inf  ;;  %1245 = vmatpush1.bf16.msra.mxu1 %v1244_v37  ;;  %v1262_v31 = vpack.c.bf16 %v601_v30, %v599_v29  ;;  %v834_v30 = vld [vmem:[#allocation8 + $0xf0] sm:$0xff] }
 0x2d2   : > { %527 = vmax.xlane.f32.xlu1 %v526_v39 }
 0x35f   : > { %v528_v40 = vpop.xlane.xlu1 %527 }
 0x360   : > { %vm529_vm2 = vcmp.eq.f32.partialorder %v526_v39, %v528_v40  ;;  %v582_v40 = vld [vmem:[#allocation10 + $0x20] sm:$0xff] }
 0x361   : > { %v530_v41 = vsel %vm529_vm2, %v2004_v28, 128 }
 0x362   : > { %v532_v42 = vshra.s32 %v530_v41, 16  ;;  %v531_v44 = vand.u32 65535, %v530_v41  ;;  %v584_v41 = vld [vmem:[#allocation10 + $0x30] sm:$0xff] }
 0x364   : > { %v534_v43 = vcvt.s32.f32 %v532_v42  ;;  %v533_v46 = vcvt.s32.f32 %v531_v44  ;;  %v587_v42 = vld [vmem:[#allocation10 + $0x48] sm:$0xff]  ;;  %v704_v44 = vld [vmem:[#allocation7 + $0xb8] sm:$0xff] }
 0x366   : > { %535 = vmin.xlane.f32.xlu1 %v534_v43 }
 0x3f3   : > { %v536_v45 = vpop.xlane.xlu1 %535 }
 0x3f4   : > { %vm537_vm3 = vcmp.eq.f32.partialorder %v534_v43, %v536_v45  ;;  %v542_v48 = vcvt.f32.s32 %v536_v45  ;;  %v702_v43 = vld [vmem:[#allocation7 + $0xa8] sm:$0xff]  ;;  %v589_v45 = vld [vmem:[#allocation10 + $0x58] sm:$0xff] }
 0x3f5   : > { %v538_v47 = vsel %vm537_vm3, %v533_v46, inf  ;;  %v1248_v46 = vpack.c.bf16 %v584_v41, %v582_v40  ;;  %v609_v40 = vld [vmem:[#allocation10 + $0xf8] sm:$0xff]  ;;  %v608_v41 = vld [vmem:[#allocation10 + $0xf0] sm:$0xff] }
 0x3f6   : > { %539 = vmin.xlane.f32.xlu0 %v538_v47  ;;  %v543_v50 = vshll.u32 %v542_v48, 16  ;;  %v1292_v47 = vpack.c.bf16 %v699_v26, %v697_v25  ;;  %v701_v48 = vld [vmem:[#allocation7 + $0xa0] sm:$0xff] }
 0x3f8   : > { %1293 = vmatpush1.bf16.msra.mxu0 %v1292_v47 }
 0x483   : > { %v540_v49 = vpop.xlane.xlu0 %539 }
 0x484   : > { %v541_v51 = vcvt.f32.s32 %v540_v49  ;;  %v1250_v49 = vpack.c.bf16 %v589_v45, %v587_v42 }
 0x486   : > { %v544_v52 = vadd.s32 %v543_v50, %v541_v51  ;;  %v586_v50 = vld [vmem:[#allocation10 + $0x40] sm:$0xff]  ;;  %v588_v51 = vld [vmem:[#allocation10 + $0x50] sm:$0xff] }
 0x488   : > { %vm545_vm4 = vcmp.eq.s32.totalorder %v2004_v28, %v544_v52  ;;  %v1294_v52 = vpack.c.bf16 %v704_v44, %v702_v43  ;;  %v820_v43 = vld [vmem:[#allocation8 + $0x80] sm:$0xff]  ;;  %v821_v44 = vld [vmem:[#allocation8 + $0x88] sm:$0xff] }
 0x489   : > { %v2020_v53 = vsel %vm545_vm4, 1.0, %v1708_v1  ;;  %v1306_v45 = vpack.c.bf16 %v821_v44, %v820_v43 }
 0x48a   : > { %vm549_vm5 = vcmp.gt.f32.partialorder %v2020_v53, 0.0  ;;  %1295 = vmatprep.subr.bf16.mxu0 %v1294_v52  ;;  %v823_v52 = vld [vmem:[#allocation8 + $0x98] sm:$0xff] }
 0x48b   : > { %v550_v54 = vsel %vm549_vm5, -inf, %v526_v39  ;;  %v1246_v39 = vpack.c.bf16 %v585_v35, %v583_v34  ;;  %v1264_v34 = vpack.c.bf16 %v600_v33, %v598_v32  ;;  %v605_v35 = vld [vmem:[#allocation10 + $0xd8] sm:$0xff]  ;;  %v818_v33 = vld [vmem:[#allocation8 + $0x70] sm:$0xff] }
 0x48c   : > { %551 = vmax.xlane.f32.xlu1 %v550_v54 }
 0x48d   : > { %1247 = vmatprep.subr.bf16.mxu1 %v1246_v39  ;;  %v604_v39 = vld [vmem:[#allocation10 + $0xd0] sm:$0xff] }
 0x48e   : > { %1249 = vmatpush1.bf16.msra.mxu1 %v1248_v46 }
 0x48f   : > { %1251 = vmatprep.subr.bf16.mxu1 %v1250_v49  ;;  %v804_v49 = vld [vmem:[#allocation8] sm:$0xff] }
 0x519   : > { %v552_v55 = vpop.xlane.xlu1 %551 }
 0x51a   : > { %vm553_vm6 = vcmp.eq.f32.partialorder %v550_v54, %v552_v55  ;;  %v703_v54 = vld [vmem:[#allocation7 + $0xb0] sm:$0xff]  ;;  %v591_v55 = vld [vmem:[#allocation10 + $0x68] sm:$0xff] }
 0x51b   : > { %v554_v56 = vsel %vm553_vm6, %v2004_v28, 128 }
 0x51c   : > { %v556_v57 = vshra.s32 %v554_v56, 16  ;;  %v555_v59 = vand.u32 65535, %v554_v56  ;;  %v593_v56 = vld [vmem:[#allocation10 + $0x78] sm:$0xff] }
 0x51d   : > { %v1254_v63 = vpack.c.bf16 %v593_v56, %v591_v55 }
 0x51e   : > { %v558_v58 = vcvt.s32.f32 %v556_v57  ;;  %v557_v61 = vcvt.s32.f32 %v555_v59  ;;  %v706_v57 = vld [vmem:[#allocation7 + $0xc8] sm:$0xff]  ;;  %v1252_v59 = vpack.c.bf16 %v588_v51, %v586_v50  ;;  %v822_v51 = vld [vmem:[#allocation8 + $0x90] sm:$0xff] }
 0x51f   : > { %v805_v50 = vld [vmem:[#allocation8 + $0x8] sm:$0xff] }
 0x520   : > { %559 = vmin.xlane.f32.xlu0 %v558_v58  ;;  %1253 = vmatpush1.bf16.msra.mxu1 %v1252_v59  ;;  %v1308_v55 = vpack.c.bf16 %v805_v50, %v804_v49  ;;  %v807_v59 = vld [vmem:[#allocation8 + $0x18] sm:$0xff] }
 0x521   : > { %1255 = vmatprep.subr.bf16.mxu1 %v1254_v63 }
 0x524   : > { %1257 = vmatpush1.bf16.msra.mxu1 %v1256_v9  ;;  %v811_v9 = vld [vmem:[#allocation8 + $0x38] sm:$0xff] }
 0x525   : > { %1259 = vmatprep.subr.bf16.mxu1 %v1258_v11  ;;  %v829_v11 = vld [vmem:[#allocation8 + $0xc8] sm:$0xff]  ;;  %v1320_v12 = vpack.c.bf16 %v811_v9, %v810_v8 }
 0x528   : > { %1261 = vmatpush1.bf16.msra.mxu1 %v1260_v17  ;;  %v831_v17 = vld [vmem:[#allocation8 + $0xd8] sm:$0xff] }
 0x529   : > { %1263 = vmatprep.subr.bf16.mxu1 %v1262_v31  ;;  %v835_v31 = vld [vmem:[#allocation8 + $0xf8] sm:$0xff] }
 0x52a   : > { %v1334_v32 = vpack.c.bf16 %v835_v31, %v834_v30 }
 0x52c   : > { %1265 = vmatpush1.bf16.msra.mxu1 %v1264_v34  ;;  %v819_v34 = vld [vmem:[#allocation8 + $0x78] sm:$0xff] }
 0x5ad   : > { %v2024_v60 = vpop.xlane.xlu0 %559 }
 0x5ae   : > { %vm561_vm7 = vcmp.eq.f32.partialorder %v558_v58, %v2024_v60  ;;  %v708_v58 = vld [vmem:[#allocation7 + $0xd8] sm:$0xff]  ;;  %v566_v20 = vcvt.f32.s32 %v2024_v60  ;;  %v603_v60 = vld [vmem:[#allocation10 + $0xc8] sm:$0xff] }
 0x5af   : > { %v562_v62 = vsel %vm561_vm7, %v557_v61, inf  ;;  %v1296_v61 = vpack.c.bf16 %v703_v54, %v701_v48  ;;  %v1298_v3 = vpack.c.bf16 %v708_v58, %v706_v57  ;;  %v1266_v37 = vpack.c.bf16 %v605_v35, %v603_v60  ;;  %v806_v58 = vld [vmem:[#allocation8 + $0x10] sm:$0xff] }
 0x5b0   : > { %563 = vmin.xlane.f32.xlu1 %v562_v62  ;;  %v705_v62 = vld [vmem:[#allocation7 + $0xc0] sm:$0xff]  ;;  %v567_v22 = vshll.u32 %v566_v20, 16  ;;  %v1310_v57 = vpack.c.bf16 %v823_v52, %v822_v51  ;;  %v1312_v63 = vpack.c.bf16 %v807_v59, %v806_v58  ;;  %v814_v20 = vld [vmem:[#allocation8 + $0x50] sm:$0xff]  ;;  %v1336_v60 = vpack.c.bf16 %v819_v34, %v818_v33 }
 0x5b1   : > { %1297 = vmatpush1.bf16.msra.mxu0 %v1296_v61  ;;  %v1300_v10 = vpack.c.bf16 %v707_v4, %v705_v62  ;;  %1267 = vmatprep.subr.bf16.mxu1 %v1266_v37  ;;  %v824_v61 = vld [vmem:[#allocation8 + $0xa0] sm:$0xff]  ;;  %v825_v62 = vld [vmem:[#allocation8 + $0xa8] sm:$0xff]  ;;  %v826_v4 = vld [vmem:[#allocation8 + $0xb0] sm:$0xff] }
 0x5b2   : > { %1299 = vmatprep.subr.bf16.mxu0 %v1298_v3  ;;  %v1314_v0 = vpack.c.bf16 %v825_v62, %v824_v61  ;;  %v809_v3 = vld [vmem:[#allocation8 + $0x28] sm:$0xff]  ;;  %v1318_v7 = vpack.c.bf16 %v827_v5, %v826_v4 }
 0x5b3   : > { %v1316_v6 = vpack.c.bf16 %v809_v3, %v808_v2 }
 0x5b5   : > { %1301 = vmatpush1.bf16.msra.mxu0 %v1300_v10  ;;  %v828_v10 = vld [vmem:[#allocation8 + $0xc0] sm:$0xff] }
 0x5b6   : > { %1303 = vmatprep.subr.bf16.mxu0 %v1302_v14  ;;  %v1322_v13 = vpack.c.bf16 %v829_v11, %v828_v10  ;;  %v812_v14 = vld [vmem:[#allocation8 + $0x40] sm:$0xff] }
 0x5b9   : > { %1305 = vmatpush1.bf16.msra.mxu0 %v1304_v18  ;;  %v1324_v18 = vpack.c.bf16 %v813_v15, %v812_v14 }
 0x5bc   : > { %778 = vmatmul.mubr.f32.vlgmr.msra.gmra.mrb[2].mxu0 %v424_v19  ;;  %v1326_v19 = vpack.c.bf16 %v831_v17, %v830_v16 }
 0x63d   : > { %v564_v21 = vpop.xlane.xlu1 %563 }
 0x63e   : > { %v565_v23 = vcvt.f32.s32 %v564_v21  ;;  %v815_v21 = vld [vmem:[#allocation8 + $0x58] sm:$0xff] }
 0x640   : > { %v568_v24 = vadd.s32 %v567_v22, %v565_v23  ;;  %v832_v22 = vld [vmem:[#allocation8 + $0xe0] sm:$0xff]  ;;  %v833_v23 = vld [vmem:[#allocation8 + $0xe8] sm:$0xff] }
 0x642   : > { %vm569_vm8 = vcmp.eq.s32.totalorder %v2004_v28, %v568_v24  ;;  %v607_v28 = vld [vmem:[#allocation10 + $0xe8] sm:$0xff]  ;;  %v1328_v24 = vpack.c.bf16 %v815_v21, %v814_v20 }
 0x643   : > { %v1124_v25 = vsel %vm569_vm8, 1.0, %v1708_v1  ;;  %v1268_v1 = vpack.c.bf16 %v604_v39, %v602_v36 }
 0x644   : > { %v572_v26 = vadd.f32 %v1124_v25, %v2020_v53  ;;  %v1270_v53 = vpack.c.bf16 %v609_v40, %v607_v28  ;;  %v1330_v25 = vpack.c.bf16 %v833_v23, %v832_v22 }
 0x645   : > { %1269 = vmatpush1.bf16.msra.mxu1 %v1268_v1 }
 0x646   : > { %v573_v27 = vmul.f32 %v572_v26, %v2012_v38  ;;  %v606_v38 = vld [vmem:[#allocation10 + $0xe0] sm:$0xff]  ;;  %1271 = vmatprep.subr.bf16.mxu1 %v1270_v53 }
 0x647   : > { %v1272_v42 = vpack.c.bf16 %v608_v41, %v606_v38  ;;  %v816_v26 = vld [vmem:[#allocation8 + $0x60] sm:$0xff] }
 0x648   : > { %574 = vadd.xlane.f32.xlu0 %v573_v27 }
 0x649   : > { %1273 = vmatpush1.bf16.msra.mxu1 %v1272_v42 }
 0x64a   : > { %1307 = vmatprep.subr.bf16.mxu1 %v1306_v45 }
 0x68f   : > { %v2037_v46 = vpop.f32.mrb[2].mxu0 }
 0x690   : > { %v2039_v47 = vpop.f32.mrb[3].mxu0  ;;  %v784_v35 = vmul.f32 %v2037_v46, %v2037_v46 }
 0x691   : > { %v785_v36 = vmul.f32 %v2039_v47, %v2039_v47 }
 0x692   : > { %v786_v37 = vmul.f32 %v784_v35, %v2037_v46 }
 0x693   : > { %v787_v39 = vmul.f32 %v785_v36, %v2039_v47 }
 0x694   : > { %v788_v28 = vmul.f32 0.044715, %v786_v37 }
 0x695   : > { %v789_v40 = vmul.f32 0.044715, %v787_v39 }
 0x696   : > { %v790_v1 = vadd.f32 %v788_v28, %v2037_v46 }
 0x697   : > { %v791_v53 = vadd.f32 %v789_v40, %v2039_v47 }
 0x698   : > { %v792_v38 = vmul.f32 0.7978846, %v790_v1 }
 0x699   : > { %v793_v41 = vmul.f32 0.7978846, %v791_v53 }
 0x6d5   : > { %v575_v48 = vpop.xlane.xlu0 %574 }
 0x6d6   : > { %1441 = vrcp.f32 %v575_v48 }
 0x6d7   : > { %1443 = vtanh.f32 %v792_v38 }
 0x6d8   : > { %1445 = vtanh.f32 %v793_v41 }
 0x6e0   : > { %v1442_v54 = vpop.eup %1441 }
 0x6e1   : > { %v577_v56 = vmul.f32 %v1442_v54, %v573_v27  ;;  %v817_v27 = vld [vmem:[#allocation8 + $0x68] sm:$0xff]  ;;  %v1444_v42 = vpop.eup %1443 }
 0x6e2   : > { %v1332_v29 = vpack.c.bf16 %v817_v27, %v816_v26  ;;  %v1446_v43 = vpop.eup %1445  ;;  %v796_v44 = vadd.f32 1.0, %v1444_v42 }
 0x6e3   : > { %675 = vmatmul.mubr.f32.vlgmr.msra.gmra.mrb[0].mxu1 %v577_v56  ;;  %v797_v45 = vadd.f32 1.0, %v1446_v43 }
 0x6e4   : > { %1309 = vmatpush3.bf16.msra.mxu1 %v1308_v55  ;;  %v798_v48 = vmul.f32 0.5, %v796_v44 }
 0x6e5   : > { %1311 = vmatprep.subr.bf16.mxu1 %v1310_v57  ;;  %v799_v49 = vmul.f32 0.5, %v797_v45 }
 0x6e6   : > { %v800_v50 = vmul.f32 %v798_v48, %v2037_v46 }
 0x6e7   : > { %v801_v52 = vmul.f32 %v799_v49, %v2039_v47 }
 0x6e8   : > { %1313 = vmatpush3.bf16.msra.mxu1 %v1312_v63 }
 0x6e9   : > { %1315 = vmatprep.subr.bf16.mxu1 %v1314_v0 }
 0x6ec   : > { %1317 = vmatpush3.bf16.msra.mxu1 %v1316_v6 }
 0x6ed   : > { %1319 = vmatprep.subr.bf16.mxu1 %v1318_v7 }
 0x6f0   : > { %1321 = vmatpush3.bf16.msra.mxu1 %v1320_v12 }
 0x6f1   : > { %1323 = vmatprep.subr.bf16.mxu1 %v1322_v13 }
 0x6f4   : > { %1325 = vmatpush3.bf16.msra.mxu1 %v1324_v18 }
 0x6f5   : > { %1327 = vmatprep.subr.bf16.mxu1 %v1326_v19 }
 0x6f8   : > { %1329 = vmatpush3.bf16.msra.mxu1 %v1328_v24 }
 0x6f9   : > { %1331 = vmatprep.subr.bf16.mxu1 %v1330_v25 }
 0x6fc   : > { %1333 = vmatpush3.bf16.msra.mxu1 %v1332_v29 }
 0x6fd   : > { %1335 = vmatprep.subr.bf16.mxu1 %v1334_v32 }
 0x700   : > { %1337 = vmatpush3.bf16.msra.mxu1 %v1336_v60 }
 0x7b6   : > { %v676_v51 = vpop.f32.mrb[0].mxu1 }
 0x7b7   : > { %v802_v54 = vmul.f32 %v800_v50, %v676_v51  ;;  %v678_v55 = vpop.f32.mrb[1].mxu1 }
 0x7b8   : > { %v803_v56 = vmul.f32 %v801_v52, %v678_v55 }
 0x7ba   : > { %901 = vmatprep.mubr.f32.mxu1 %v803_v56 }
 0x7bb   : > { %902 = vmatmul.mubr.f32.vlgmr.msra.gmra.mrb[2].mxu1 %v802_v54 }
 0x7bc   : > { %1602 = shalt.err (!%p1599_p2)
}
 0x7bd   : > { %s1603_s25 = scalar_lea.hbm %s938_s10, 128  ;;  %s1607_s22 = scalar_lea.hbm %s2138_s8, 256 }
 0x7be   : > { %p1604_p8 = scmp.ne.s32.totalorder %s938_s10, %s1603_s25  ;;  %p1608_p11 = scmp.lt.u32.totalorder %s938_s10, %s2138_s8 }
 0x7bf   : > { %p1609_p1 = scmp.lt.u32.totalorder %s1607_s22, %s1603_s25  ;;  %p1611_p5 = scmp.lt.u32.totalorder %s1603_s25, %s938_s10 }
 0x7c0   : > { %p1605_p4 = pnand %p1604_p8, %p2161_p7 }
 0x7c1   : > { %p1610_p6 = por %p1609_p1, %p1608_p11 }
 0x7c2   : > { %p1606_p10 = pneg %p1605_p4 }
 0x7c3   : > { %p1612_p9 = por %p1611_p5, %p1610_p6 }
 0x7c5   : > { %p1613_p12 = pnand %p1612_p9, %p1606_p10 }
 0x7c7   : > { %1616 = shalt.err (!%p1613_p12)
}
 0x7c8   : > { %1357 = dma.vmem_to_hbm [thread:$0]  (%p2161_p7), %s2054_s26, 128, %s938_s10, %s914_s23  }
 0x7c9   : > { %s2162_s18 = scalar_lea.vmem [#allocation2], %s1975_s14  ;;  %s408_s0 = scalar_lea.vmem [#allocation11], %s1975_s14 }
 0x7ca   : > { %v836_v47 = vld [vmem:[%s2162_s18] sm:$0xff]  ;;  %s927_s17 = sshll.u32 %s408_s0, 4  ;;  %s2163_s22 = sshll.u32 %s1777_s11, 7  ;;  %s2088_s17 = int_to_ptr.vmem [resolvable:$true] %s927_s17 }
 0x7cb   : > { %s2086_s20 = scalar_lea.hbm %s2137_s7, %s2163_s22  ;;  %s909_s26 = scalar_lea.sflag [#allocation4], %s1972_s3 }
 0x7cc   : > { %s1617_s10 = scalar_lea.vmem %s2088_s17, 128  ;;  %s1710_s14 = smov [#allocation11]  }
 0x7cd   : > { %p1618_p3 = scmp.ne.s32.totalorder %s2088_s17, %s1617_s10  ;;  %s1621_s23 = sshll.u32 %s1710_s14, 4  ;;  %s1622_s23 = int_to_ptr.vmem [resolvable:$false] %s1621_s23 }
 0x7ce   : > { %s1623_s11 = scalar_lea.vmem %s1622_s23, 256  ;;  %p1624_p2 = scmp.lt.s32.totalorder %s2088_s17, %s1622_s23 }
 0x7cf   : > { %p1619_p13 = pnand %p1618_p3, %p2161_p7  ;;  %p1625_p8 = scmp.lt.s32.totalorder %s1623_s11, %s1617_s10 }
 0x7d1   : > { %p1620_p0 = pneg %p1619_p13  ;;  %p1626_p4 = por %p1625_p8, %p1624_p2 }
 0x7d3   : > { %p1627_p10 = pnand %p1626_p4, %p1620_p0 }
 0x88e   : > { %v1180_v46 = vpop.f32.mrb[2].mxu1 }
 0x88f   : > { %v1181_v57 = vpop.f32.mrb[3].mxu1 }
 0x890   : > { %v1182_v58 = vadd.f32 %v1181_v57, %v1180_v46 }
 0x892   : > { %v904_v59 = vadd.f32 %v1182_v58, %v836_v47 }
 0x894   : > { %907 = vst [vmem:[%s408_s0] sm:$0xff] %v904_v59 }
 0x895   : > { %1630 = shalt.err (!%p1627_p10)
}
 0x896   : > { %s1631_s3 = scalar_lea.hbm %s2086_s20, 128  ;;  %s1635_s9 = scalar_lea.hbm %s2137_s7, 256 }
 0x897   : > { %p1632_p11 = scmp.ne.s32.totalorder %s2086_s20, %s1631_s3  ;;  %p1636_p5 = scmp.lt.u32.totalorder %s2086_s20, %s2137_s7 }
 0x898   : > { %p1637_p9 = scmp.lt.u32.totalorder %s1635_s9, %s1631_s3  ;;  %p1639_p3 = scmp.lt.u32.totalorder %s1631_s3, %s2086_s20 }
 0x899   : > { %p1633_p1 = pnand %p1632_p11, %p2161_p7 }
 0x89a   : > { %p1638_p12 = por %p1637_p9, %p1636_p5 }
 0x89b   : > { %p1634_p6 = pneg %p1633_p1 }
 0x89c   : > { %p1640_p13 = por %p1639_p3, %p1638_p12 }
 0x89e   : > { %p1641_p0 = pnand %p1640_p13, %p1634_p6 }
 0x8a0   : > { %1644 = shalt.err (!%p1641_p0)
}
 0x8a1   : > { %1356 = dma.vmem_to_hbm [thread:$0]  (%p2161_p7), %s2088_s17, 128, %s2086_s20, %s909_s26  }
 0x8a2 PF: > { %s952_s22 = sand.u32 1, %s1683_s27   ;;  %p2164_p2 = scmp.ne.s32.totalorder %s2153_s24, 0 }
 0x8a3   : > { %p2165_p8 = scmp.ge.s32.totalorder %s1695_s30, 2  ;;  %s953_s13 = scalar_lea.sflag [#allocation4], %s952_s22 }
 0x8a5   : > { %p1378_p4 = pnand %p2165_p8, %p2164_p2 }
 0x8a7   : > { %1674 = dma.done.wait (!%p1378_p4), %s953_s13, 128  }
 0x8a8   : > { %1676 = vsyncadd (!%p1378_p4), %s953_s13, 4294967168  ;;  %s962_s16 = scalar_lea.sflag [#allocation13], %s952_s22 }
 0x8a9   : > { %1678 = dma.done.wait (!%p1378_p4), %s962_s16, 128  }
 0x8aa   : > { %1680 = vsyncadd (!%p1378_p4), %s962_s16, 4294967168  ;;  %p27_p7 = scmp.ge.s32.totalorder %s1896_s15, 4   ;;  %s2166_s27 = smov %s1687_s28 }
 0x8ab   : > { %s2167_s28 = smov %s1691_s29  ;;  %s2168_s29 = smov %s1907_s21 }
 0x8ac   : > { %s2169_s30 = smov %s1896_s15  ;;  %29 = sbr.rel (!%p27_p7) target bundleno = 12 (0xc), region = 132 }
 0x8b3   :  { %967 = vsyncpa [#allocation3], 1 }
 0x8b4   :  { %969 = vsyncpa [#allocation3 + $0x1], 1 }
 0x8b5   :  { %970 = vsyncpa [#allocation6], 1 }
 0x8b6   :  { %971 = vsyncpa [#allocation9], 1 }
 0x8b7   :  { %972 = vsyncpa [#allocation4], 1 }
 0x8b8   :  { %974 = vsyncpa [#allocation4 + $0x1], 1 }
 0x8b9   :  { %975 = vsyncpa [#allocation13], 1 }
 0x8ba   :  { %977 = vsyncpa [#allocation13 + $0x1], 1 }

</bundles_post_ra>
